<compile_context>
chip_gen: v7x
topology: tpu7x:2x2x1
jax: 0.10.0
libtpu: 0.0.40
codegen_flags: <defaults>
</compile_context>

<pallas_src>
import functools

import jax
import jax.numpy as jnp
from jax import lax
from jax.experimental import pallas as pl
from jax.experimental.pallas import tpu as pltpu

EPS = 1e-5
NEG_INF = float("-inf")


# ----------------------------------------------------------------------------
# Kernel: one point tile of one batch element per grid step.
# ----------------------------------------------------------------------------
def _pointnet_kernel(x_ref,
                     w1, b1, w2, b2, w3, b3, w4, b4,
                     wh1, bh1, wh2, bh2, wh3, bh3,
                     out_ref, acc_ref, *, n_points, tile_n):
    f32 = jnp.float32
    bf16 = jnp.bfloat16
    p = pl.program_id(1)

    # New batch element -> reset the running max (layer 4 has no ReLU, so
    # activations may be negative; must init to -inf, not 0).
    @pl.when(p == 0)
    def _():
        acc_ref[...] = jnp.full_like(acc_ref, NEG_INF)

    # Per-point MLP 8->128->128->256->512 (BN folded into W/b).  bf16 operands,
    # f32 accumulation; ReLU fused with the bf16 downcast so only one copy of
    # each activation is live.
    h = jnp.dot(x_ref[...], w1[...], preferred_element_type=f32) + b1[...]
    h = jnp.maximum(h, 0.0).astype(bf16)
    h = jnp.dot(h, w2[...], preferred_element_type=f32) + b2[...]
    h = jnp.maximum(h, 0.0).astype(bf16)
    h = jnp.dot(h, w3[...], preferred_element_type=f32) + b3[...]
    h = jnp.maximum(h, 0.0).astype(bf16)
    h = jnp.dot(h, w4[...], preferred_element_type=f32) + b4[...]   # (TN, 512) f32

    # Mask zero-padded point rows so they can never win the max.
    if n_points % tile_n != 0:
        row = lax.broadcasted_iota(jnp.int32, h.shape, 0)
        h = jnp.where(row + p * tile_n < n_points, h, NEG_INF)

    # Running elementwise max (VPU; overlaps the next tile's MXU work).
    acc_ref[...] = jnp.maximum(acc_ref[...], h)

    # Heads only on the final point tile of this batch element.
    @pl.when(p == pl.num_programs(1) - 1)
    def _():
        feat = jnp.max(acc_ref[...], axis=0, keepdims=True).astype(bf16)  # (1, 512)
        # Packed m/v heads: one matmul per layer serving both branches.
        t = jnp.dot(feat, wh1[...], preferred_element_type=f32) + bh1[...]
        t = jnp.maximum(t, 0.0).astype(bf16)
        t = jnp.dot(t, wh2[...], preferred_element_type=f32) + bh2[...]
        t = jnp.maximum(t, 0.0).astype(bf16)
        out_ref[...] = jnp.dot(t, wh3[...], preferred_element_type=f32) + bh3[...]


# ----------------------------------------------------------------------------
# Parameter construction (deterministic, synthetic, eval-mode BN folded).
# ----------------------------------------------------------------------------
def init_params(key, point_dim, zdim, num_anchors):
    """Eval-mode params with BatchNorm folded into (W, b):  y = x @ W + b."""
    def nrm(k, shape, scale=0.05):
        return scale * jax.random.normal(k, shape, dtype=jnp.float32)

    keys = iter(jax.random.split(key, 64))

    def fused_linear_bn(cin, cout):
        w = nrm(next(keys), (cin, cout))
        bias = nrm(next(keys), (cout,))
        gamma = 1.0 + nrm(next(keys), (cout,), 0.1)
        beta = nrm(next(keys), (cout,))
        mean = nrm(next(keys), (cout,), 0.1)
        var = 0.5 + jnp.abs(nrm(next(keys), (cout,), 0.1))
        s = gamma / jnp.sqrt(var + EPS)
        return w * s[None, :], (s * (bias - mean) + beta)[None, :]

    def linear(cin, cout):
        return nrm(next(keys), (cin, cout)), nrm(next(keys), (cout,))[None, :]

    zo = zdim * num_anchors
    return {
        "conv": [fused_linear_bn(point_dim, 128), fused_linear_bn(128, 128),
                 fused_linear_bn(128, 256), fused_linear_bn(256, 512)],
        "m": [fused_linear_bn(512, 256), fused_linear_bn(256, 128), linear(128, zo)],
        "v": [fused_linear_bn(512, 256), fused_linear_bn(256, 128), linear(128, zo)],
    }


def _block_diag(a, b):
    out = jnp.zeros((a.shape[0] + b.shape[0], a.shape[1] + b.shape[1]), jnp.float32)
    out = out.at[:a.shape[0], :a.shape[1]].set(a)
    out = out.at[a.shape[0]:, a.shape[1]:].set(b)
    return out


def _prepare_kernel_params(params, point_dim):
    """Pad/concat/cast the fused params into the layout the kernel expects."""
    bf16 = jnp.bfloat16
    cin_pad = ((point_dim + 7) // 8) * 8

    (w1, b1), (w2, b2), (w3, b3), (w4, b4) = params["conv"]
    w1p = jnp.zeros((cin_pad, w1.shape[1]), jnp.float32).at[:point_dim, :].set(w1)
    conv = [(w1p.astype(bf16), b1), (w2.astype(bf16), b2),
            (w3.astype(bf16), b3), (w4.astype(bf16), b4)]

    (wm1, bm1), (wm2, bm2), (wm3, bm3) = params["m"]
    (wv1, bv1), (wv2, bv2), (wv3, bv3) = params["v"]
    wh1 = jnp.concatenate([wm1, wv1], axis=1)          # (512, 512)
    bh1 = jnp.concatenate([bm1, bv1], axis=1)
    wh2 = _block_diag(wm2, wv2)                        # (512, 256)
    bh2 = jnp.concatenate([bm2, bv2], axis=1)
    wh3 = _block_diag(wm3, wv3)                        # (256, 2*zo)
    bh3 = jnp.concatenate([bm3, bv3], axis=1)
    head = [(wh1.astype(bf16), bh1), (wh2.astype(bf16), bh2), (wh3.astype(bf16), bh3)]
    return conv, head, cin_pad


# ----------------------------------------------------------------------------
# Wrapper
# ----------------------------------------------------------------------------
@functools.partial(jax.jit, static_argnums=(2, 3))
def pointnet_vae_forward(x, params, zdim, num_anchors):
    B, N, Cin = x.shape
    conv, head, cin_pad = _prepare_kernel_params(params, Cin)
    zo = zdim * num_anchors

    # Point-axis tile: multiple of 8 sublanes, capped at 512 rows so the live
    # (TN, 512) f32 accumulator + activations stay well inside v7x's 64 MiB
    # VMEM (and v5e's 16 MiB scoped default).
    tile_n = min(512, ((N + 7) // 8) * 8)
    n_tiles = int(pl.cdiv(N, tile_n))
    n_pad = n_tiles * tile_n

    # Single fused pad+cast pass over x: channels Cin->cin_pad, points N->n_pad.
    x_p = jnp.pad(x.astype(jnp.bfloat16),
                  ((0, 0), (0, n_pad - N), (0, cin_pad - Cin)))

    weights = []
    for (w, b) in conv + head:
        weights += [w, b]

    # All weights resident in VMEM across the whole grid (constant index_map,
    # full-array blocks; ~0.5 MiB bf16 total).
    weight_specs = [pl.BlockSpec(w.shape, lambda b, p: (0, 0)) for w in weights]

    flops = (2 * B * N * (cin_pad * 128 + 128 * 128 + 128 * 256 + 256 * 512)
             + 2 * B * (512 * 512 + 512 * 256 + 256 * 2 * zo))
    bytes_accessed = (x_p.size * 2
                      + sum(int(w.size) * w.dtype.itemsize for w in weights)
                      + B * 2 * zo * 4)

    out = pl.pallas_call(
        functools.partial(_pointnet_kernel, n_points=N, tile_n=tile_n),
        out_shape=jax.ShapeDtypeStruct((B, 1, 2 * zo), jnp.float32),
        grid_spec=pltpu.PrefetchScalarGridSpec(
            num_scalar_prefetch=0,
            grid=(B, n_tiles),                       # reduction (point) axis last
            in_specs=[pl.BlockSpec((None, tile_n, cin_pad),
                                   lambda b, p: (b, p, 0))] + weight_specs,
            out_specs=pl.BlockSpec((None, 1, 2 * zo), lambda b, p: (b, 0, 0)),
            scratch_shapes=[pltpu.VMEM((tile_n, 512), jnp.float32)],
        ),
        compiler_params=pltpu.CompilerParams(
            dimension_semantics=("parallel", "arbitrary"),   # batch -> megacore on v7x
            vmem_limit_bytes=64 * 1024 * 1024),
        cost_estimate=pl.CostEstimate(flops=flops, transcendentals=0,
                                      bytes_accessed=bytes_accessed),
    )(x_p, *weights)

    out = out[:, 0, :]
    m = out[:, :zo].reshape(B, num_anchors, zdim)
    v = out[:, zo:].reshape(B, num_anchors, zdim)
    return m, v


# ----------------------------------------------------------------------------
# Pure-JAX reference with identical math (BN fused, bf16 operands, f32 accum).
# ----------------------------------------------------------------------------
def ref_forward(x, params, zdim, num_anchors):
    B, N, Cin = x.shape
    bf16 = jnp.bfloat16

    def lin(h, w, b, relu=True):
        y = jnp.dot(h.astype(bf16), w.astype(bf16),
                    preferred_element_type=jnp.float32) + b
        return jnp.maximum(y, 0.0) if relu else y

    h = x.reshape(B * N, Cin)
    (w1, b1), (w2, b2), (w3, b3), (w4, b4) = params["conv"]
    h = lin(h, w1, b1)
    h = lin(h, w2, b2)
    h = lin(h, w3, b3)
    h = lin(h, w4, b4, relu=False)
    feat = jnp.max(h.reshape(B, N, -1), axis=1)  # (B, 512)

    def headf(f, ps):
        (a1, c1), (a2, c2), (a3, c3) = ps
        t = lin(f, a1, c1)
        t = lin(t, a2, c2)
        return lin(t, a3, c3, relu=False)

    m = headf(feat, params["m"]).reshape(B, num_anchors, zdim)
    v = headf(feat, params["v"]).reshape(B, num_anchors, zdim)
    return m, v


if __name__ == "__main__":
    B, N, point_dim = 2, 64, 7
    zdim, num_anchors = 64, 4

    key = jax.random.PRNGKey(0)
    k_x, k_p = jax.random.split(key)
    x = jax.random.normal(k_x, (B, N, point_dim), dtype=jnp.float32)
    params = init_params(k_p, point_dim, zdim, num_anchors)

    m, v = pointnet_vae_forward(x, params, zdim, num_anchors)
    jax.block_until_ready((m, v))

    m_ref, v_ref = ref_forward(x, params, zdim, num_anchors)
    assert m.shape == (B, num_anchors, zdim) and v.shape == (B, num_anchors, zdim)
    assert jnp.allclose(m, m_ref, atol=1e-2, rtol=1e-2)
    assert jnp.allclose(v, v_ref, atol=1e-2, rtol=1e-2)

    print("KERNEL_OK")
</pallas_src>

<mosaic_0001>
module attributes {stable_mosaic.version = 11 : i64} {
  func.func @_pointnet_kernel(%arg0: i32, %arg1: i32, %arg2: memref<1x64x8xbf16, #tpu.memory_space<vmem>>, %arg3: memref<8x128xbf16, #tpu.memory_space<vmem>>, %arg4: memref<1x128xf32, #tpu.memory_space<vmem>>, %arg5: memref<128x128xbf16, #tpu.memory_space<vmem>>, %arg6: memref<1x128xf32, #tpu.memory_space<vmem>>, %arg7: memref<128x256xbf16, #tpu.memory_space<vmem>>, %arg8: memref<1x256xf32, #tpu.memory_space<vmem>>, %arg9: memref<256x512xbf16, #tpu.memory_space<vmem>>, %arg10: memref<1x512xf32, #tpu.memory_space<vmem>>, %arg11: memref<512x512xbf16, #tpu.memory_space<vmem>>, %arg12: memref<1x512xf32, #tpu.memory_space<vmem>>, %arg13: memref<512x256xbf16, #tpu.memory_space<vmem>>, %arg14: memref<1x256xf32, #tpu.memory_space<vmem>>, %arg15: memref<256x512xbf16, #tpu.memory_space<vmem>>, %arg16: memref<1x512xf32, #tpu.memory_space<vmem>>, %arg17: memref<1x1x512xf32, #tpu.memory_space<vmem>>, %arg18: memref<64x512xf32, #tpu.memory_space<vmem>>) attributes {dimension_semantics = [#tpu.dimension_semantics<parallel>, #tpu.dimension_semantics<arbitrary>], iteration_bounds = array<i64: 2, 1>, scalar_prefetch = 0 : i64, scratch_operands = 1 : i64, tpu.core_type = #tpu.core_type<tc>, window_params = [{transform_indices = @transform_0, window_bounds = array<i64: 1, 64, 8>}, {pipeline_mode = #tpu.pipeline_mode<synchronous>, transform_indices = @transform_1, window_bounds = array<i64: 8, 128>}, {pipeline_mode = #tpu.pipeline_mode<synchronous>, transform_indices = @transform_2, window_bounds = array<i64: 1, 128>}, {pipeline_mode = #tpu.pipeline_mode<synchronous>, transform_indices = @transform_3, window_bounds = array<i64: 128, 128>}, {pipeline_mode = #tpu.pipeline_mode<synchronous>, transform_indices = @transform_4, window_bounds = array<i64: 1, 128>}, {pipeline_mode = #tpu.pipeline_mode<synchronous>, transform_indices = @transform_5, window_bounds = array<i64: 128, 256>}, {pipeline_mode = #tpu.pipeline_mode<synchronous>, transform_indices = @transform_6, window_bounds = array<i64: 1, 256>}, {pipeline_mode = #tpu.pipeline_mode<synchronous>, transform_indices = @transform_7, window_bounds = array<i64: 256, 512>}, {pipeline_mode = #tpu.pipeline_mode<synchronous>, transform_indices = @transform_8, window_bounds = array<i64: 1, 512>}, {pipeline_mode = #tpu.pipeline_mode<synchronous>, transform_indices = @transform_9, window_bounds = array<i64: 512, 512>}, {pipeline_mode = #tpu.pipeline_mode<synchronous>, transform_indices = @transform_10, window_bounds = array<i64: 1, 512>}, {pipeline_mode = #tpu.pipeline_mode<synchronous>, transform_indices = @transform_11, window_bounds = array<i64: 512, 256>}, {pipeline_mode = #tpu.pipeline_mode<synchronous>, transform_indices = @transform_12, window_bounds = array<i64: 1, 256>}, {pipeline_mode = #tpu.pipeline_mode<synchronous>, transform_indices = @transform_13, window_bounds = array<i64: 256, 512>}, {pipeline_mode = #tpu.pipeline_mode<synchronous>, transform_indices = @transform_14, window_bounds = array<i64: 1, 512>}, {transform_indices = @transform_15, window_bounds = array<i64: 1, 1, 512>}]} {
    %c0_i32 = arith.constant 0 : i32
    %0 = arith.cmpi eq, %arg1, %c0_i32 : i32
    %1 = arith.extui %0 : i1 to i32
    %c0_i32_0 = arith.constant 0 : i32
    %2 = arith.cmpi ne, %1, %c0_i32_0 : i32
    scf.if %2 {
      %cst_31 = arith.constant 0xFF800000 : f32
      %40 = vector.broadcast %cst_31 : f32 to vector<64x512xf32>
      %c0_32 = arith.constant 0 : index
      %c0_33 = arith.constant 0 : index
      %41 = vector.load %arg18[%c0_32, %c0_33] : memref<64x512xf32, #tpu.memory_space<vmem>>, vector<64x512xf32>
      tpu.vector_store %arg18[%c0_32, %c0_33], %40 {strides = array<i32>} : memref<64x512xf32, #tpu.memory_space<vmem>>, vector<64x512xf32>,
    } else {
    }
    %c0 = arith.constant 0 : index
    %c0_1 = arith.constant 0 : index
    %c0_2 = arith.constant 0 : index
    %3 = vector.load %arg2[%c0, %c0_1, %c0_2] : memref<1x64x8xbf16, #tpu.memory_space<vmem>>, vector<1x64x8xbf16>
    %4 = vector.shape_cast %3 : vector<1x64x8xbf16> to vector<64x8xbf16>
    %c0_3 = arith.constant 0 : index
    %c0_4 = arith.constant 0 : index
    %5 = vector.load %arg3[%c0_3, %c0_4] : memref<8x128xbf16, #tpu.memory_space<vmem>>, vector<8x128xbf16>
    %cst = arith.constant dense<0.000000e+00> : vector<64x128xf32>
    %6 = tpu.matmul %4, %5, %cst {dimension_numbers = #tpu.dot_dimension_numbers<[1], [0], [0], [1], [0, 0, 1, 1], [], []>} : vector<64x8xbf16>, vector<8x128xbf16>, vector<64x128xf32> -> vector<64x128xf32>
    %c0_5 = arith.constant 0 : index
    %c0_6 = arith.constant 0 : index
    %7 = vector.load %arg4[%c0_5, %c0_6] : memref<1x128xf32, #tpu.memory_space<vmem>>, vector<1x128xf32>
    %8 = vector.broadcast %7 : vector<1x128xf32> to vector<64x128xf32>
    %9 = arith.addf %6, %8 : vector<64x128xf32>
    %cst_7 = arith.constant 0.000000e+00 : f32
    %10 = vector.broadcast %cst_7 : f32 to vector<64x128xf32>
    %11 = arith.maximumf %9, %10 : vector<64x128xf32>
    %12 = arith.truncf %11 : vector<64x128xf32> to vector<64x128xbf16>
    %c0_8 = arith.constant 0 : index
    %c0_9 = arith.constant 0 : index
    %13 = vector.load %arg5[%c0_8, %c0_9] : memref<128x128xbf16, #tpu.memory_space<vmem>>, vector<128x128xbf16>
    %cst_10 = arith.constant dense<0.000000e+00> : vector<64x128xf32>
    %14 = tpu.matmul %12, %13, %cst_10 {dimension_numbers = #tpu.dot_dimension_numbers<[1], [0], [0], [1], [0, 0, 1, 1], [], []>} : vector<64x128xbf16>, vector<128x128xbf16>, vector<64x128xf32> -> vector<64x128xf32>
    %c0_11 = arith.constant 0 : index
    %c0_12 = arith.constant 0 : index
    %15 = vector.load %arg6[%c0_11, %c0_12] : memref<1x128xf32, #tpu.memory_space<vmem>>, vector<1x128xf32>
    %16 = vector.broadcast %15 : vector<1x128xf32> to vector<64x128xf32>
    %17 = arith.addf %14, %16 : vector<64x128xf32>
    %cst_13 = arith.constant 0.000000e+00 : f32
    %18 = vector.broadcast %cst_13 : f32 to vector<64x128xf32>
    %19 = arith.maximumf %17, %18 : vector<64x128xf32>
    %20 = arith.truncf %19 : vector<64x128xf32> to vector<64x128xbf16>
    %c0_14 = arith.constant 0 : index
    %c0_15 = arith.constant 0 : index
    %21 = vector.load %arg7[%c0_14, %c0_15] : memref<128x256xbf16, #tpu.memory_space<vmem>>, vector<128x256xbf16>
    %cst_16 = arith.constant dense<0.000000e+00> : vector<64x256xf32>
    %22 = tpu.matmul %20, %21, %cst_16 {dimension_numbers = #tpu.dot_dimension_numbers<[1], [0], [0], [1], [0, 0, 1, 1], [], []>} : vector<64x128xbf16>, vector<128x256xbf16>, vector<64x256xf32> -> vector<64x256xf32>
    %c0_17 = arith.constant 0 : index
    %c0_18 = arith.constant 0 : index
    %23 = vector.load %arg8[%c0_17, %c0_18] : memref<1x256xf32, #tpu.memory_space<vmem>>, vector<1x256xf32>
    %24 = vector.broadcast %23 : vector<1x256xf32> to vector<64x256xf32>
    %25 = arith.addf %22, %24 : vector<64x256xf32>
    %cst_19 = arith.constant 0.000000e+00 : f32
    %26 = vector.broadcast %cst_19 : f32 to vector<64x256xf32>
    %27 = arith.maximumf %25, %26 : vector<64x256xf32>
    %28 = arith.truncf %27 : vector<64x256xf32> to vector<64x256xbf16>
    %c0_20 = arith.constant 0 : index
    %c0_21 = arith.constant 0 : index
    %29 = vector.load %arg9[%c0_20, %c0_21] : memref<256x512xbf16, #tpu.memory_space<vmem>>, vector<256x512xbf16>
    %cst_22 = arith.constant dense<0.000000e+00> : vector<64x512xf32>
    %30 = tpu.matmul %28, %29, %cst_22 {dimension_numbers = #tpu.dot_dimension_numbers<[1], [0], [0], [1], [0, 0, 1, 1], [], []>} : vector<64x256xbf16>, vector<256x512xbf16>, vector<64x512xf32> -> vector<64x512xf32>
    %c0_23 = arith.constant 0 : index
    %c0_24 = arith.constant 0 : index
    %31 = vector.load %arg10[%c0_23, %c0_24] : memref<1x512xf32, #tpu.memory_space<vmem>>, vector<1x512xf32>
    %32 = vector.broadcast %31 : vector<1x512xf32> to vector<64x512xf32>
    %33 = arith.addf %30, %32 : vector<64x512xf32>
    %c0_25 = arith.constant 0 : index
    %c0_26 = arith.constant 0 : index
    %34 = vector.load %arg18[%c0_25, %c0_26] : memref<64x512xf32, #tpu.memory_space<vmem>>, vector<64x512xf32>
    %35 = arith.maximumf %34, %33 : vector<64x512xf32>
    %c0_27 = arith.constant 0 : index
    %c0_28 = arith.constant 0 : index
    %36 = vector.load %arg18[%c0_27, %c0_28] : memref<64x512xf32, #tpu.memory_space<vmem>>, vector<64x512xf32>
    tpu.vector_store %arg18[%c0_27, %c0_28], %35 {strides = array<i32>} : memref<64x512xf32, #tpu.memory_space<vmem>>, vector<64x512xf32>,
    %c0_i32_29 = arith.constant 0 : i32
    %37 = arith.cmpi eq, %arg1, %c0_i32_29 : i32
    %38 = arith.extui %37 : i1 to i32
    %c0_i32_30 = arith.constant 0 : i32
    %39 = arith.cmpi ne, %38, %c0_i32_30 : i32
    scf.if %39 {
      %c0_31 = arith.constant 0 : index
      %c0_32 = arith.constant 0 : index
      %40 = vector.load %arg18[%c0_31, %c0_32] : memref<64x512xf32, #tpu.memory_space<vmem>>, vector<64x512xf32>
      %cst_33 = arith.constant dense<0xFF800000> : vector<512xf32>
      %41 = vector.multi_reduction <maximumf>, %40, %cst_33 [0] : vector<64x512xf32> to vector<512xf32>
      %42 = vector.shape_cast %41 : vector<512xf32> to vector<1x512xf32>
      %43 = arith.truncf %42 : vector<1x512xf32> to vector<1x512xbf16>
      %c0_34 = arith.constant 0 : index
      %c0_35 = arith.constant 0 : index
      %44 = vector.load %arg11[%c0_34, %c0_35] : memref<512x512xbf16, #tpu.memory_space<vmem>>, vector<512x512xbf16>
      %cst_36 = arith.constant dense<0.000000e+00> : vector<1x512xf32>
      %45 = tpu.matmul %43, %44, %cst_36 {dimension_numbers = #tpu.dot_dimension_numbers<[1], [0], [0], [1], [0, 0, 1, 1], [], []>} : vector<1x512xbf16>, vector<512x512xbf16>, vector<1x512xf32> -> vector<1x512xf32>
      %c0_37 = arith.constant 0 : index
      %c0_38 = arith.constant 0 : index
      %46 = vector.load %arg12[%c0_37, %c0_38] : memref<1x512xf32, #tpu.memory_space<vmem>>, vector<1x512xf32>
      %47 = arith.addf %45, %46 : vector<1x512xf32>
      %cst_39 = arith.constant 0.000000e+00 : f32
      %48 = vector.broadcast %cst_39 : f32 to vector<1x512xf32>
      %49 = arith.maximumf %47, %48 : vector<1x512xf32>
      %50 = arith.truncf %49 : vector<1x512xf32> to vector<1x512xbf16>
      %c0_40 = arith.constant 0 : index
      %c0_41 = arith.constant 0 : index
      %51 = vector.load %arg13[%c0_40, %c0_41] : memref<512x256xbf16, #tpu.memory_space<vmem>>, vector<512x256xbf16>
      %cst_42 = arith.constant dense<0.000000e+00> : vector<1x256xf32>
      %52 = tpu.matmul %50, %51, %cst_42 {dimension_numbers = #tpu.dot_dimension_numbers<[1], [0], [0], [1], [0, 0, 1, 1], [], []>} : vector<1x512xbf16>, vector<512x256xbf16>, vector<1x256xf32> -> vector<1x256xf32>
      %c0_43 = arith.constant 0 : index
      %c0_44 = arith.constant 0 : index
      %53 = vector.load %arg14[%c0_43, %c0_44] : memref<1x256xf32, #tpu.memory_space<vmem>>, vector<1x256xf32>
      %54 = arith.addf %52, %53 : vector<1x256xf32>
      %cst_45 = arith.constant 0.000000e+00 : f32
      %55 = vector.broadcast %cst_45 : f32 to vector<1x256xf32>
      %56 = arith.maximumf %54, %55 : vector<1x256xf32>
      %57 = arith.truncf %56 : vector<1x256xf32> to vector<1x256xbf16>
      %c0_46 = arith.constant 0 : index
      %c0_47 = arith.constant 0 : index
      %58 = vector.load %arg15[%c0_46, %c0_47] : memref<256x512xbf16, #tpu.memory_space<vmem>>, vector<256x512xbf16>
      %cst_48 = arith.constant dense<0.000000e+00> : vector<1x512xf32>
      %59 = tpu.matmul %57, %58, %cst_48 {dimension_numbers = #tpu.dot_dimension_numbers<[1], [0], [0], [1], [0, 0, 1, 1], [], []>} : vector<1x256xbf16>, vector<256x512xbf16>, vector<1x512xf32> -> vector<1x512xf32>
      %c0_49 = arith.constant 0 : index
      %c0_50 = arith.constant 0 : index
      %60 = vector.load %arg16[%c0_49, %c0_50] : memref<1x512xf32, #tpu.memory_space<vmem>>, vector<1x512xf32>
      %61 = arith.addf %59, %60 : vector<1x512xf32>
      %c0_51 = arith.constant 0 : index
      %c0_52 = arith.constant 0 : index
      %c0_53 = arith.constant 0 : index
      %62 = vector.load %arg17[%c0_51, %c0_52, %c0_53] : memref<1x1x512xf32, #tpu.memory_space<vmem>>, vector<1x1x512xf32>
      %63 = vector.shape_cast %62 : vector<1x1x512xf32> to vector<1x512xf32>
      %64 = vector.shape_cast %61 : vector<1x512xf32> to vector<1x1x512xf32>
      tpu.vector_store %arg17[%c0_51, %c0_52, %c0_53], %64 {strides = array<i32>} : memref<1x1x512xf32, #tpu.memory_space<vmem>>, vector<1x1x512xf32>,
    } else {
    }
    return
  }
  func.func @transform_0(%arg0: i32, %arg1: i32) -> (i32, i32, i32) {
    %c0_i32 = arith.constant 0 : i32
    %c0_i32_0 = arith.constant 0 : i32
    return %arg0, %arg1, %c0_i32 : i32, i32, i32
  }
  func.func @transform_1(%arg0: i32, %arg1: i32) -> (i32, i32) {
    %c0_i32 = arith.constant 0 : i32
    %c0_i32_0 = arith.constant 0 : i32
    %c0_i32_1 = arith.constant 0 : i32
    return %c0_i32, %c0_i32_0 : i32, i32
  }
  func.func @transform_2(%arg0: i32, %arg1: i32) -> (i32, i32) {
    %c0_i32 = arith.constant 0 : i32
    %c0_i32_0 = arith.constant 0 : i32
    %c0_i32_1 = arith.constant 0 : i32
    return %c0_i32, %c0_i32_0 : i32, i32
  }
  func.func @transform_3(%arg0: i32, %arg1: i32) -> (i32, i32) {
    %c0_i32 = arith.constant 0 : i32
    %c0_i32_0 = arith.constant 0 : i32
    %c0_i32_1 = arith.constant 0 : i32
    return %c0_i32, %c0_i32_0 : i32, i32
  }
  func.func @transform_4(%arg0: i32, %arg1: i32) -> (i32, i32) {
    %c0_i32 = arith.constant 0 : i32
    %c0_i32_0 = arith.constant 0 : i32
    %c0_i32_1 = arith.constant 0 : i32
    return %c0_i32, %c0_i32_0 : i32, i32
  }
  func.func @transform_5(%arg0: i32, %arg1: i32) -> (i32, i32) {
    %c0_i32 = arith.constant 0 : i32
    %c0_i32_0 = arith.constant 0 : i32
    %c0_i32_1 = arith.constant 0 : i32
    return %c0_i32, %c0_i32_0 : i32, i32
  }
  func.func @transform_6(%arg0: i32, %arg1: i32) -> (i32, i32) {
    %c0_i32 = arith.constant 0 : i32
    %c0_i32_0 = arith.constant 0 : i32
    %c0_i32_1 = arith.constant 0 : i32
    return %c0_i32, %c0_i32_0 : i32, i32
  }
  func.func @transform_7(%arg0: i32, %arg1: i32) -> (i32, i32) {
    %c0_i32 = arith.constant 0 : i32
    %c0_i32_0 = arith.constant 0 : i32
    %c0_i32_1 = arith.constant 0 : i32
    return %c0_i32, %c0_i32_0 : i32, i32
  }
  func.func @transform_8(%arg0: i32, %arg1: i32) -> (i32, i32) {
    %c0_i32 = arith.constant 0 : i32
    %c0_i32_0 = arith.constant 0 : i32
    %c0_i32_1 = arith.constant 0 : i32
    return %c0_i32, %c0_i32_0 : i32, i32
  }
  func.func @transform_9(%arg0: i32, %arg1: i32) -> (i32, i32) {
    %c0_i32 = arith.constant 0 : i32
    %c0_i32_0 = arith.constant 0 : i32
    %c0_i32_1 = arith.constant 0 : i32
    return %c0_i32, %c0_i32_0 : i32, i32
  }
  func.func @transform_10(%arg0: i32, %arg1: i32) -> (i32, i32) {
    %c0_i32 = arith.constant 0 : i32
    %c0_i32_0 = arith.constant 0 : i32
    %c0_i32_1 = arith.constant 0 : i32
    return %c0_i32, %c0_i32_0 : i32, i32
  }
  func.func @transform_11(%arg0: i32, %arg1: i32) -> (i32, i32) {
    %c0_i32 = arith.constant 0 : i32
    %c0_i32_0 = arith.constant 0 : i32
    %c0_i32_1 = arith.constant 0 : i32
    return %c0_i32, %c0_i32_0 : i32, i32
  }
  func.func @transform_12(%arg0: i32, %arg1: i32) -> (i32, i32) {
    %c0_i32 = arith.constant 0 : i32
    %c0_i32_0 = arith.constant 0 : i32
    %c0_i32_1 = arith.constant 0 : i32
    return %c0_i32, %c0_i32_0 : i32, i32
  }
  func.func @transform_13(%arg0: i32, %arg1: i32) -> (i32, i32) {
    %c0_i32 = arith.constant 0 : i32
    %c0_i32_0 = arith.constant 0 : i32
    %c0_i32_1 = arith.constant 0 : i32
    return %c0_i32, %c0_i32_0 : i32, i32
  }
  func.func @transform_14(%arg0: i32, %arg1: i32) -> (i32, i32) {
    %c0_i32 = arith.constant 0 : i32
    %c0_i32_0 = arith.constant 0 : i32
    %c0_i32_1 = arith.constant 0 : i32
    return %c0_i32, %c0_i32_0 : i32, i32
  }
  func.func @transform_15(%arg0: i32, %arg1: i32) -> (i32, i32, i32) {
    %c0_i32 = arith.constant 0 : i32
    %c0_i32_0 = arith.constant 0 : i32
    %c0_i32_1 = arith.constant 0 : i32
    return %arg0, %c0_i32, %c0_i32_0 : i32, i32, i32
  }
}

</mosaic_0001>

<bundles_post_ra>
// kernel: pointnet_vae_forward.1
= control target key start
LH: loop header
LB: loop body
LE: loop exit
PB: predicated region body
PF: predicated region fallthrough
CT: control target
= control target key end

     0   :  { %s6678_s0 = inlined_call_operand.hbm [shape: bf16[2,64,8], index: 0, kind: input, shape index: {}]   ;;  %s6679_s1 = inlined_call_operand.hbm [shape: bf16[8,128], index: 1, kind: input, shape index: {}]   ;;  %s6680_s2 = inlined_call_operand.hbm [shape: f32[1,128], index: 2, kind: input, shape index: {}]   ;;  %s6681_s3 = inlined_call_operand.hbm [shape: bf16[128,128], index: 3, kind: input, shape index: {}]   ;;  %s6682_s4 = inlined_call_operand.hbm [shape: f32[1,128], index: 4, kind: input, shape index: {}]   ;;  %s6683_s5 = inlined_call_operand.hbm [shape: bf16[128,256], index: 5, kind: input, shape index: {}]   ;;  %s6684_s6 = inlined_call_operand.hbm [shape: f32[1,256], index: 6, kind: input, shape index: {}]   ;;  %s6685_s7 = inlined_call_operand.hbm [shape: bf16[256,512], index: 7, kind: input, shape index: {}]   ;;  %s6686_s8 = inlined_call_operand.hbm [shape: f32[1,512], index: 8, kind: input, shape index: {}]   ;;  %s6687_s9 = inlined_call_operand.hbm [shape: bf16[512,512], index: 9, kind: input, shape index: {}]   ;;  %s6688_s10 = inlined_call_operand.hbm [shape: f32[1,512], index: 10, kind: input, shape index: {}]   ;;  %s6689_s11 = inlined_call_operand.hbm [shape: bf16[512,256], index: 11, kind: input, shape index: {}]   ;;  %s6690_s12 = inlined_call_operand.hbm [shape: f32[1,256], index: 12, kind: input, shape index: {}]   ;;  %s6691_s13 = inlined_call_operand.hbm [shape: bf16[256,512], index: 13, kind: input, shape index: {}]   ;;  %s6692_s14 = inlined_call_operand.hbm [shape: f32[1,512], index: 14, kind: input, shape index: {}]   ;;  %s6693_s15 = inlined_call_operand.hbm [shape: f32[2,1,512], index: 15, kind: output, shape index: {}]  }
   0x1   :  { %6711 = sst [smem:[#allocation42_spill]] %s6678_s0 }
   0x2   :  { %6712 = sst [smem:[#allocation43_spill]] %s6679_s1 }
   0x3   :  { %6713 = sst [smem:[#allocation44_spill]] %s6680_s2 }
   0x4   :  { %6714 = sst [smem:[#allocation45_spill]] %s6681_s3 }
   0x5   :  { %6715 = sst [smem:[#allocation46_spill]] %s6682_s4 }
   0x6   :  { %6716 = sst [smem:[#allocation47_spill]] %s6693_s15 }
   0x7   :  { %20 = vsyncpa [#allocation4], 0 }
   0x8   :  { %22 = vsyncpa [#allocation4 + $0x1], 0 }
   0x9   :  { %23 = vsyncpa [#allocation7], 0 }
   0xa   :  { %24 = vsyncpa [#allocation10], 0 }
   0xb   :  { %25 = vsyncpa [#allocation13], 0 }
   0xc   :  { %26 = vsyncpa [#allocation16], 0 }
   0xd   :  { %27 = vsyncpa [#allocation19], 0 }
   0xe   :  { %28 = vsyncpa [#allocation22], 0 }
   0xf   :  { %29 = vsyncpa [#allocation25], 0 }
  0x10   :  { %30 = vsyncpa [#allocation5], 0 }
  0x11   :  { %32 = vsyncpa [#allocation5 + $0x1], 0  ;;  %s6005_s18 = smov 0   ;;  %s6007_s19 = smov 0  }
  0x12   :  { %s6009_s20 = smov 0   ;;  %s6011_s21 = smov 0  }
  0x13   :  { %s6013_s22 = smov 0   ;;  %s6015_s23 = smov 0  }
  0x14 LB: > { %6717 = sst [smem:[#allocation37_spill]] %s5879_s18  ;;  %s6694_s24 = sadd.s32 4294967295, %s5899_s23   ;;  %s5899_s23 = sphi %s6015_s23, %s38_s23   ;;  %s5895_s22 = sphi %s6013_s22, %s6762_s22   ;;  %s5891_s21 = sphi %s6011_s21, %s6761_s21   ;;  %s5887_s20 = sphi %s6009_s20, %s6760_s20   ;;  %s5883_s19 = sphi %s6007_s19, %s6759_s19   ;;  %s5879_s18 = sphi %s6005_s18, %s6758_s18  }
  0x15   : > { %6718 = sst [smem:[#allocation38_spill]] %s5883_s19  ;;  %p4173_p0 = scmp.ge.s32.totalorder %s5899_s23, 1 }
  0x16   : > { %6719 = sst [smem:[#allocation39_spill]] %s5891_s21  ;;  %p6039_p1 = scmp.eq.s32.totalorder %s6694_s24, 0 }
  0x17   : > { %p403_p2 = scmp.lt.s32.totalorder %s5899_s23, 3  ;;  %s5901_s27 = smov [#allocation6]  }
  0x18   : > { %s6720_s25 = scalar_select %p6039_p1, 1, 0 }
  0x19   : > { %p6044_p3 = pnand %p4173_p0, %p403_p2  ;;  %s416_s28 = sshll.u32 %s5901_s27, 4  ;;  %s417_s28 = int_to_ptr.vmem [resolvable:$true] %s416_s28 }
  0x1a   : > { %6721 = sst [smem:[#allocation40_spill]] %s6720_s25  ;;  %s5902_s29 = smov [#allocation9]  }
  0x1b   : > { %s6722_s26 = scalar_select %p6044_p3, 1, 0 }
  0x1c   : > { %p4700_p5 = pneg %p6044_p3  ;;  %s437_s30 = sshll.u32 %s5902_s29, 4  ;;  %s6057_s30 = int_to_ptr.vmem [resolvable:$true] %s437_s30 }
  0x1d   : > { %6723 = sst [smem:[#allocation41_spill]] %s6722_s26  ;;  %s5903_s17 = smov [#allocation12]  }
  0x1e   : > { %p6053_p6 = pnand %p4700_p5, %p6039_p1  ;;  %s6059_s24 = sshll.u32 %s5903_s17, 4  ;;  %s462_s24 = int_to_ptr.vmem [resolvable:$true] %s6059_s24 }
  0x1f   : > { %s6725_s1 = sld [smem:[#allocation43_spill]] }
  0x20   : > { %p6069_p8 = pneg %p6053_p6 }
  0x25   : > { %s5367_s27 = scalar_lea.hbm %s6725_s1, 64 }
  0x26   : > { %p5368_p7 = scmp.ne.s32.totalorder %s6725_s1, %s5367_s27  ;;  %p5374_p11 = scmp.lt.u32.totalorder %s5367_s27, %s6725_s1 }
  0x28   : > { %p5370_p9 = pnand %p6069_p8, %p5368_p7 }
  0x2a   : > { %p5371_p10 = pneg %p5370_p9 }
  0x2c   : > { %p5376_p12 = pnand %p5374_p11, %p5371_p10 }
  0x2e   : > { %5379 = shalt.err (!%p5376_p12)
}
  0x2f   : > { %s5380_s15 = scalar_lea.vmem %s417_s28, 64  ;;  %p5388_p5 = scmp.lt.s32.totalorder %s417_s28, %s417_s28 }
  0x30   : > { %p5381_p13 = scmp.ne.s32.totalorder %s417_s28, %s5380_s15  ;;  %p5389_p4 = scmp.lt.s32.totalorder %s5380_s15, %s5380_s15 }
  0x32   : > { %p5383_p0 = pnand %p5381_p13, %p6069_p8  ;;  %p5390_p3 = por %p5389_p4, %p5388_p5 }
  0x34   : > { %p5384_p2 = pneg %p5383_p0 }
  0x36   : > { %p5391_p1 = pnand %p5390_p3, %p5384_p2 }
  0x38   : > { %5394 = shalt.err (!%p5391_p1)
}
  0x39   : > { %4703 = dma.hbm_to_vmem [thread:$0]  (!%p6053_p6), %s6725_s1, 64, %s417_s28, [#allocation7]  }
  0x3a   : > { %s6727_s3 = sld [smem:[#allocation45_spill]] }
  0x40   : > { %s5395_s27 = scalar_lea.hbm %s6727_s3, 1024 }
  0x41   : > { %p5396_p7 = scmp.ne.s32.totalorder %s6727_s3, %s5395_s27  ;;  %p5402_p1 = scmp.lt.u32.totalorder %s5395_s27, %s6727_s3 }
  0x43   : > { %p5398_p9 = pnand %p5396_p7, %p6069_p8 }
  0x45   : > { %p5399_p4 = pneg %p5398_p9 }
  0x47   : > { %p5404_p3 = pnand %p5402_p1, %p5399_p4 }
  0x49   : > { %5407 = shalt.err (!%p5404_p3)
}
  0x4a   : > { %s5408_s28 = scalar_lea.vmem %s6057_s30, 1024  ;;  %p5416_p13 = scmp.lt.s32.totalorder %s6057_s30, %s6057_s30 }
  0x4b   : > { %p5409_p10 = scmp.ne.s32.totalorder %s6057_s30, %s5408_s28  ;;  %p5417_p0 = scmp.lt.s32.totalorder %s5408_s28, %s5408_s28 }
  0x4d   : > { %p5411_p11 = pnand %p5409_p10, %p6069_p8  ;;  %p5418_p2 = por %p5417_p0, %p5416_p13 }
  0x4f   : > { %p5412_p12 = pneg %p5411_p11 }
  0x51   : > { %p5419_p5 = pnand %p5418_p2, %p5412_p12 }
  0x53   : > { %5422 = shalt.err (!%p5419_p5)
}
  0x54   : > { %s6704_s18 = smov 64   ;;  %s6705_s19 = smov 4  }
  0x55   : > { %4709 = dma.hbm_to_vmem [thread:$0]  (!%p6053_p6), %s6727_s3, 1024, %s6057_s30, [#allocation10], %s6704_s18, %s6704_s18, %s6705_s19  }
  0x56   : > { %s5423_s27 = scalar_lea.hbm %s6683_s5, 2048 }
  0x57   : > { %p5424_p7 = scmp.ne.s32.totalorder %s6683_s5, %s5423_s27  ;;  %p5430_p1 = scmp.lt.u32.totalorder %s5423_s27, %s6683_s5 }
  0x59   : > { %p5426_p9 = pnand %p5424_p7, %p6069_p8 }
  0x5b   : > { %p5427_p4 = pneg %p5426_p9 }
  0x5d   : > { %p5432_p3 = pnand %p5430_p1, %p5427_p4 }
  0x5f   : > { %5435 = shalt.err (!%p5432_p3)
}
  0x60   : > { %s5436_s0 = scalar_lea.vmem %s462_s24, 2048  ;;  %p5444_p13 = scmp.lt.s32.totalorder %s462_s24, %s462_s24 }
  0x61   : > { %p5437_p10 = scmp.ne.s32.totalorder %s462_s24, %s5436_s0  ;;  %p5445_p0 = scmp.lt.s32.totalorder %s5436_s0, %s5436_s0 }
  0x63   : > { %p5439_p11 = pnand %p5437_p10, %p6069_p8  ;;  %p5446_p2 = por %p5445_p0, %p5444_p13 }
  0x65   : > { %p5440_p12 = pneg %p5439_p11 }
  0x67   : > { %p5447_p5 = pnand %p5446_p2, %p5440_p12 }
  0x69   : > { %5450 = shalt.err (!%p5447_p5)
}
  0x6a   : > { %s6706_s30 = smov 128   ;;  %s6707_s21 = smov 8  }
  0x6b   : > { %4715 = dma.hbm_to_vmem [thread:$0]  (!%p6053_p6), %s6683_s5, 2048, %s462_s24, [#allocation13], %s6706_s30, %s6706_s30, %s6707_s21  }
  0x6c   : > { %s5908_s26 = smov [#allocation15]   ;;  %s5451_s28 = scalar_lea.hbm %s6685_s7, 8192 }
  0x6d   : > { %s485_s27 = sshll.u32 %s5908_s26, 4  ;;  %p5452_p7 = scmp.ne.s32.totalorder %s6685_s7, %s5451_s28  ;;  %s486_s27 = int_to_ptr.vmem [resolvable:$true] %s485_s27 }
  0x6e   : > { %p5458_p1 = scmp.lt.u32.totalorder %s5451_s28, %s6685_s7 }
  0x6f   : > { %p5454_p9 = pnand %p5452_p7, %p6069_p8 }
  0x71   : > { %p5455_p4 = pneg %p5454_p9 }
  0x73   : > { %p5460_p3 = pnand %p5458_p1, %p5455_p4 }
  0x75   : > { %5463 = shalt.err (!%p5460_p3)
}
  0x76   : > { %s5464_s24 = scalar_lea.vmem %s486_s27, 8192  ;;  %p5472_p13 = scmp.lt.s32.totalorder %s486_s27, %s486_s27 }
  0x77   : > { %p5465_p10 = scmp.ne.s32.totalorder %s486_s27, %s5464_s24  ;;  %p5473_p0 = scmp.lt.s32.totalorder %s5464_s24, %s5464_s24 }
  0x79   : > { %p5467_p11 = pnand %p5465_p10, %p6069_p8  ;;  %p5474_p2 = por %p5473_p0, %p5472_p13 }
  0x7b   : > { %p5468_p12 = pneg %p5467_p11 }
  0x7d   : > { %p5475_p5 = pnand %p5474_p2, %p5468_p12 }
  0x7f   : > { %5478 = shalt.err (!%p5475_p5)
}
  0x80   : > { %s6708_s18 = smov 256   ;;  %s6709_s1 = smov 16  }
  0x81   : > { %4721 = dma.hbm_to_vmem [thread:$0]  (!%p6053_p6), %s6685_s7, 8192, %s486_s27, [#allocation16], %s6708_s18, %s6708_s18, %s6709_s1  }
  0x82   : > { %s5911_s25 = smov [#allocation18]   ;;  %s5912_s17 = smov [#allocation21]  }
  0x83   : > { %s509_s26 = sshll.u32 %s5911_s25, 4  ;;  %s533_s15 = sshll.u32 %s5912_s17, 4  ;;  %s510_s26 = int_to_ptr.vmem [resolvable:$true] %s509_s26  ;;  %s6154_s15 = int_to_ptr.vmem [resolvable:$true] %s533_s15 }
  0x84   : > { %s5479_s24 = scalar_lea.hbm %s6687_s9, 16384 }
  0x85   : > { %p5480_p7 = scmp.ne.s32.totalorder %s6687_s9, %s5479_s24  ;;  %p5486_p1 = scmp.lt.u32.totalorder %s5479_s24, %s6687_s9 }
  0x87   : > { %p5482_p9 = pnand %p5480_p7, %p6069_p8 }
  0x89   : > { %p5483_p4 = pneg %p5482_p9 }
  0x8b   : > { %p5488_p3 = pnand %p5486_p1, %p5483_p4 }
  0x8d   : > { %5491 = shalt.err (!%p5488_p3)
}
  0x8e   : > { %s5492_s19 = scalar_lea.vmem %s510_s26, 16384  ;;  %p5500_p13 = scmp.lt.s32.totalorder %s510_s26, %s510_s26 }
  0x8f   : > { %p5493_p10 = scmp.ne.s32.totalorder %s510_s26, %s5492_s19  ;;  %p5501_p0 = scmp.lt.s32.totalorder %s5492_s19, %s5492_s19 }
  0x91   : > { %p5495_p11 = pnand %p5493_p10, %p6069_p8  ;;  %p5502_p2 = por %p5501_p0, %p5500_p13 }
  0x93   : > { %p5496_p12 = pneg %p5495_p11 }
  0x95   : > { %p5503_p5 = pnand %p5502_p2, %p5496_p12 }
  0x97   : > { %5506 = shalt.err (!%p5503_p5)
}
  0x98   : > { %4727 = dma.hbm_to_vmem [thread:$0]  (!%p6053_p6), %s6687_s9, 16384, %s510_s26, [#allocation19], %s6708_s18, %s6708_s18, %s6709_s1  }
  0x99   : > { %s5507_s28 = scalar_lea.hbm %s6689_s11, 8192 }
  0x9a   : > { %p5508_p7 = scmp.ne.s32.totalorder %s6689_s11, %s5507_s28  ;;  %p5514_p1 = scmp.lt.u32.totalorder %s5507_s28, %s6689_s11 }
  0x9c   : > { %p5510_p9 = pnand %p5508_p7, %p6069_p8 }
  0x9e   : > { %p5511_p4 = pneg %p5510_p9 }
  0xa0   : > { %p5516_p3 = pnand %p5514_p1, %p5511_p4 }
  0xa2   : > { %5519 = shalt.err (!%p5516_p3)
}
  0xa3   : > { %s5520_s26 = scalar_lea.vmem %s6154_s15, 8192  ;;  %p5528_p13 = scmp.lt.s32.totalorder %s6154_s15, %s6154_s15 }
  0xa4   : > { %p5521_p10 = scmp.ne.s32.totalorder %s6154_s15, %s5520_s26  ;;  %p5529_p0 = scmp.lt.s32.totalorder %s5520_s26, %s5520_s26 }
  0xa6   : > { %p5523_p11 = pnand %p5521_p10, %p6069_p8  ;;  %p5530_p2 = por %p5529_p0, %p5528_p13 }
  0xa8   : > { %p5524_p12 = pneg %p5523_p11 }
  0xaa   : > { %p5531_p5 = pnand %p5530_p2, %p5524_p12 }
  0xac   : > { %5534 = shalt.err (!%p5531_p5)
}
  0xad   : > { %s6728_s19 = smov 8   ;;  %s6729_s30 = smov 128  }
  0xae   : > { %4733 = dma.hbm_to_vmem [thread:$0]  (!%p6053_p6), %s6689_s11, 8192, %s6154_s15, [#allocation22], %s6729_s30, %s6729_s30, %s6728_s19  }
  0xaf   : > { %s5913_s17 = smov [#allocation24]   ;;  %s5914_s0 = smov [#allocation8]  }
  0xb0   : > { %s557_s28 = sshll.u32 %s5913_s17, 4  ;;  %s427_s24 = sshll.u32 %s5914_s0, 4  ;;  %s558_s28 = int_to_ptr.vmem [resolvable:$true] %s557_s28  ;;  %s6203_s24 = int_to_ptr.vmem [resolvable:$true] %s427_s24 }
  0xb1   : > { %s5535_s26 = scalar_lea.hbm %s6691_s13, 8192 }
  0xb2   : > { %p5536_p7 = scmp.ne.s32.totalorder %s6691_s13, %s5535_s26  ;;  %p5542_p1 = scmp.lt.u32.totalorder %s5535_s26, %s6691_s13 }
  0xb4   : > { %p5538_p9 = pnand %p5536_p7, %p6069_p8 }
  0xb6   : > { %p5539_p4 = pneg %p5538_p9 }
  0xb8   : > { %p5544_p3 = pnand %p5542_p1, %p5539_p4 }
  0xba   : > { %5547 = shalt.err (!%p5544_p3)
}
  0xbb   : > { %s5548_s19 = scalar_lea.vmem %s558_s28, 8192  ;;  %p5556_p13 = scmp.lt.s32.totalorder %s558_s28, %s558_s28 }
  0xbc   : > { %p5549_p10 = scmp.ne.s32.totalorder %s558_s28, %s5548_s19  ;;  %p5557_p0 = scmp.lt.s32.totalorder %s5548_s19, %s5548_s19 }
  0xbe   : > { %p5551_p11 = pnand %p5549_p10, %p6069_p8  ;;  %p5558_p2 = por %p5557_p0, %p5556_p13 }
  0xc0   : > { %p5552_p12 = pneg %p5551_p11 }
  0xc2   : > { %p5559_p5 = pnand %p5558_p2, %p5552_p12 }
  0xc4   : > { %5562 = shalt.err (!%p5559_p5)
}
  0xc5   : > { %s6730_s18 = smov 16   ;;  %s6731_s1 = smov 256  }
  0xc6   : > { %4739 = dma.hbm_to_vmem [thread:$0]  (!%p6053_p6), %s6691_s13, 8192, %s558_s28, [#allocation25], %s6731_s1, %s6731_s1, %s6730_s18  }
  0xc7   : > { %s6732_s2 = sld [smem:[#allocation44_spill]] }
  0xcd   : > { %s5563_s3 = scalar_lea.hbm %s6732_s2, 16 }
  0xce   : > { %p5564_p7 = scmp.ne.s32.totalorder %s6732_s2, %s5563_s3  ;;  %p5570_p1 = scmp.lt.u32.totalorder %s5563_s3, %s6732_s2 }
  0xd0   : > { %p5566_p9 = pnand %p5564_p7, %p6069_p8 }
  0xd2   : > { %p5567_p4 = pneg %p5566_p9 }
  0xd4   : > { %p5572_p3 = pnand %p5570_p1, %p5567_p4 }
  0xd6   : > { %5575 = shalt.err (!%p5572_p3)
}
  0xd7   : > { %s5576_s28 = scalar_lea.vmem %s6203_s24, 16  ;;  %s5583_s19 = scalar_lea.vmem %s6203_s24, 32 }
  0xd8   : > { %p5577_p10 = scmp.ne.s32.totalorder %s6203_s24, %s5576_s28  ;;  %p5584_p13 = scmp.lt.s32.totalorder %s6203_s24, %s6203_s24 }
  0xd9   : > { %p5585_p0 = scmp.lt.s32.totalorder %s5583_s19, %s5576_s28 }
  0xda   : > { %p5579_p11 = pnand %p5577_p10, %p6069_p8 }
  0xdb   : > { %p5586_p2 = por %p5585_p0, %p5584_p13 }
  0xdc   : > { %p5580_p12 = pneg %p5579_p11 }
  0xde   : > { %p5587_p5 = pnand %p5586_p2, %p5580_p12 }
  0xe0   : > { %5590 = shalt.err (!%p5587_p5)
}
  0xe1   : > { %4706 = dma.hbm_to_vmem [thread:$0]  (!%p6053_p6), %s6732_s2, 16, %s6203_s24, [#allocation7]  }
  0xe2   : > { %s5915_s30 = smov [#allocation11]   ;;  %s5916_s17 = smov [#allocation14]  }
  0xe3   : > { %s451_s25 = sshll.u32 %s5915_s30, 4  ;;  %s475_s0 = sshll.u32 %s5916_s17, 4  ;;  %s452_s25 = int_to_ptr.vmem [resolvable:$true] %s451_s25  ;;  %s6250_s0 = int_to_ptr.vmem [resolvable:$true] %s475_s0 }
  0xe4   : > { %s6733_s4 = sld [smem:[#allocation46_spill]] }
  0xea   : > { %s5591_s26 = scalar_lea.hbm %s6733_s4, 16 }
  0xeb   : > { %p5592_p7 = scmp.ne.s32.totalorder %s6733_s4, %s5591_s26  ;;  %p5598_p1 = scmp.lt.u32.totalorder %s5591_s26, %s6733_s4 }
  0xed   : > { %p5594_p9 = pnand %p5592_p7, %p6069_p8 }
  0xef   : > { %p5595_p4 = pneg %p5594_p9 }
  0xf1   : > { %p5600_p3 = pnand %p5598_p1, %p5595_p4 }
  0xf3   : > { %5603 = shalt.err (!%p5600_p3)
}
  0xf4   : > { %s5604_s19 = scalar_lea.vmem %s452_s25, 16  ;;  %s5611_s18 = scalar_lea.vmem %s452_s25, 32 }
  0xf5   : > { %p5605_p10 = scmp.ne.s32.totalorder %s452_s25, %s5604_s19  ;;  %p5612_p13 = scmp.lt.s32.totalorder %s452_s25, %s452_s25 }
  0xf6   : > { %p5613_p0 = scmp.lt.s32.totalorder %s5611_s18, %s5604_s19 }
  0xf7   : > { %p5607_p11 = pnand %p5605_p10, %p6069_p8 }
  0xf8   : > { %p5614_p2 = por %p5613_p0, %p5612_p13 }
  0xf9   : > { %p5608_p12 = pneg %p5607_p11 }
  0xfb   : > { %p5615_p5 = pnand %p5614_p2, %p5608_p12 }
  0xfd   : > { %5618 = shalt.err (!%p5615_p5)
}
  0xfe   : > { %4712 = dma.hbm_to_vmem [thread:$0]  (!%p6053_p6), %s6733_s4, 16, %s452_s25, [#allocation10]  }
  0xff   : > { %s5619_s27 = scalar_lea.hbm %s6684_s6, 32 }
 0x100   : > { %p5620_p7 = scmp.ne.s32.totalorder %s6684_s6, %s5619_s27  ;;  %p5626_p1 = scmp.lt.u32.totalorder %s5619_s27, %s6684_s6 }
 0x102   : > { %p5622_p9 = pnand %p5620_p7, %p6069_p8 }
 0x104   : > { %p5623_p4 = pneg %p5622_p9 }
 0x106   : > { %p5628_p3 = pnand %p5626_p1, %p5623_p4 }
 0x108   : > { %5631 = shalt.err (!%p5628_p3)
}
 0x109   : > { %s5632_s25 = scalar_lea.vmem %s6250_s0, 32  ;;  %p5640_p13 = scmp.lt.s32.totalorder %s6250_s0, %s6250_s0 }
 0x10a   : > { %p5633_p10 = scmp.ne.s32.totalorder %s6250_s0, %s5632_s25  ;;  %p5641_p0 = scmp.lt.s32.totalorder %s5632_s25, %s5632_s25 }
 0x10c   : > { %p5635_p11 = pnand %p5633_p10, %p6069_p8  ;;  %p5642_p2 = por %p5641_p0, %p5640_p13 }
 0x10e   : > { %p5636_p12 = pneg %p5635_p11 }
 0x110   : > { %p5643_p5 = pnand %p5642_p2, %p5636_p12 }
 0x112   : > { %5646 = shalt.err (!%p5643_p5)
}
 0x113   : > { %4718 = dma.hbm_to_vmem [thread:$0]  (!%p6053_p6), %s6684_s6, 32, %s6250_s0, [#allocation13]  }
 0x114   : > { %s5917_s18 = smov [#allocation17]   ;;  %s5918_s30 = smov [#allocation20]  }
 0x115   : > { %s499_s1 = sshll.u32 %s5917_s18, 4  ;;  %s523_s17 = sshll.u32 %s5918_s30, 4  ;;  %s500_s1 = int_to_ptr.vmem [resolvable:$true] %s499_s1  ;;  %s6293_s17 = int_to_ptr.vmem [resolvable:$true] %s523_s17 }
 0x116   : > { %s5647_s26 = scalar_lea.hbm %s6686_s8, 64 }
 0x117   : > { %p5648_p7 = scmp.ne.s32.totalorder %s6686_s8, %s5647_s26  ;;  %p5654_p1 = scmp.lt.u32.totalorder %s5647_s26, %s6686_s8 }
 0x119   : > { %p5650_p9 = pnand %p5648_p7, %p6069_p8 }
 0x11b   : > { %p5651_p4 = pneg %p5650_p9 }
 0x11d   : > { %p5656_p3 = pnand %p5654_p1, %p5651_p4 }
 0x11f   : > { %5659 = shalt.err (!%p5656_p3)
}
 0x120   : > { %s5660_s25 = scalar_lea.vmem %s500_s1, 64  ;;  %p5668_p13 = scmp.lt.s32.totalorder %s500_s1, %s500_s1 }
 0x121   : > { %p5661_p10 = scmp.ne.s32.totalorder %s500_s1, %s5660_s25  ;;  %p5669_p0 = scmp.lt.s32.totalorder %s5660_s25, %s5660_s25 }
 0x123   : > { %p5663_p11 = pnand %p5661_p10, %p6069_p8  ;;  %p5670_p2 = por %p5669_p0, %p5668_p13 }
 0x125   : > { %p5664_p12 = pneg %p5663_p11 }
 0x127   : > { %p5671_p5 = pnand %p5670_p2, %p5664_p12 }
 0x129   : > { %5674 = shalt.err (!%p5671_p5)
}
 0x12a   : > { %4724 = dma.hbm_to_vmem [thread:$0]  (!%p6053_p6), %s6686_s8, 64, %s500_s1, [#allocation16]  }
 0x12b   : > { %s5675_s3 = scalar_lea.hbm %s6688_s10, 64 }
 0x12c   : > { %p5676_p7 = scmp.ne.s32.totalorder %s6688_s10, %s5675_s3  ;;  %p5682_p1 = scmp.lt.u32.totalorder %s5675_s3, %s6688_s10 }
 0x12e   : > { %p5678_p9 = pnand %p5676_p7, %p6069_p8 }
 0x130   : > { %p5679_p4 = pneg %p5678_p9 }
 0x132   : > { %p5684_p3 = pnand %p5682_p1, %p5679_p4 }
 0x134   : > { %5687 = shalt.err (!%p5684_p3)
}
 0x135   : > { %s5688_s1 = scalar_lea.vmem %s6293_s17, 64  ;;  %p5696_p13 = scmp.lt.s32.totalorder %s6293_s17, %s6293_s17 }
 0x136   : > { %p5689_p10 = scmp.ne.s32.totalorder %s6293_s17, %s5688_s1  ;;  %p5697_p0 = scmp.lt.s32.totalorder %s5688_s1, %s5688_s1 }
 0x138   : > { %p5691_p11 = pnand %p5689_p10, %p6069_p8  ;;  %p5698_p2 = por %p5697_p0, %p5696_p13 }
 0x13a   : > { %p5692_p12 = pneg %p5691_p11 }
 0x13c   : > { %p5699_p5 = pnand %p5698_p2, %p5692_p12 }
 0x13e   : > { %5702 = shalt.err (!%p5699_p5)
}
 0x13f   : > { %4730 = dma.hbm_to_vmem [thread:$0]  (!%p6053_p6), %s6688_s10, 64, %s6293_s17, [#allocation19]  }
 0x140   : > { %s5919_s25 = smov [#allocation23]   ;;  %s5920_s19 = smov [#allocation26]  }
 0x141   : > { %s547_s24 = sshll.u32 %s5919_s25, 4  ;;  %s571_s18 = sshll.u32 %s5920_s19, 4  ;;  %s548_s24 = int_to_ptr.vmem [resolvable:$true] %s547_s24  ;;  %s6336_s18 = int_to_ptr.vmem [resolvable:$true] %s571_s18 }
 0x142   : > { %s5703_s27 = scalar_lea.hbm %s6690_s12, 32 }
 0x143   : > { %p5704_p7 = scmp.ne.s32.totalorder %s6690_s12, %s5703_s27  ;;  %p5710_p1 = scmp.lt.u32.totalorder %s5703_s27, %s6690_s12 }
 0x145   : > { %p5706_p9 = pnand %p5704_p7, %p6069_p8 }
 0x147   : > { %p5707_p4 = pneg %p5706_p9 }
 0x149   : > { %p5712_p3 = pnand %p5710_p1, %p5707_p4 }
 0x14b   : > { %5715 = shalt.err (!%p5712_p3)
}
 0x14c   : > { %s5716_s1 = scalar_lea.vmem %s548_s24, 32  ;;  %p5724_p13 = scmp.lt.s32.totalorder %s548_s24, %s548_s24 }
 0x14d   : > { %p5717_p10 = scmp.ne.s32.totalorder %s548_s24, %s5716_s1  ;;  %p5725_p0 = scmp.lt.s32.totalorder %s5716_s1, %s5716_s1 }
 0x14f   : > { %p5719_p11 = pnand %p5717_p10, %p6069_p8  ;;  %p5726_p2 = por %p5725_p0, %p5724_p13 }
 0x151   : > { %p5720_p12 = pneg %p5719_p11 }
 0x153   : > { %p5727_p5 = pnand %p5726_p2, %p5720_p12 }
 0x155   : > { %5730 = shalt.err (!%p5727_p5)
}
 0x156   : > { %4736 = dma.hbm_to_vmem [thread:$0]  (!%p6053_p6), %s6690_s12, 32, %s548_s24, [#allocation22]  }
 0x157   : > { %s5731_s30 = scalar_lea.hbm %s6692_s14, 64 }
 0x158   : > { %p5732_p7 = scmp.ne.s32.totalorder %s6692_s14, %s5731_s30  ;;  %p5738_p1 = scmp.lt.u32.totalorder %s5731_s30, %s6692_s14 }
 0x15a   : > { %p5734_p9 = pnand %p5732_p7, %p6069_p8 }
 0x15c   : > { %p5735_p4 = pneg %p5734_p9 }
 0x15e   : > { %p5740_p3 = pnand %p5738_p1, %p5735_p4 }
 0x160   : > { %5743 = shalt.err (!%p5740_p3)
}
 0x161   : > { %s5744_s24 = scalar_lea.vmem %s6336_s18, 64  ;;  %p5752_p13 = scmp.lt.s32.totalorder %s6336_s18, %s6336_s18 }
 0x162   : > { %p5745_p10 = scmp.ne.s32.totalorder %s6336_s18, %s5744_s24  ;;  %p5753_p0 = scmp.lt.s32.totalorder %s5744_s24, %s5744_s24 }
 0x164   : > { %p5747_p11 = pnand %p5745_p10, %p6069_p8  ;;  %p5754_p2 = por %p5753_p0, %p5752_p13 }
 0x166   : > { %p5748_p12 = pneg %p5747_p11 }
 0x168   : > { %p5755_p5 = pnand %p5754_p2, %p5748_p12 }
 0x16a   : > { %5758 = shalt.err (!%p5755_p5)
}
 0x16b   : > { %s6734_s1 = sld [smem:[#allocation38_spill]]  ;;  %s6735_s29 = sld [smem:[#allocation37_spill]] }
 0x16c   : > { %s6736_s28 = sld [smem:[#allocation40_spill]]  ;;  %s4172_s0 = sadd.s32 4294967294, %s5899_s23  }
 0x16d   : > { %4742 = dma.hbm_to_vmem [thread:$0]  (!%p6053_p6), %s6692_s14, 64, %s6336_s18, [#allocation25]  }
 0x16e   : > { %s50_s25 = sadd.s32 1, %s5895_s22  ;;  %s59_s16 = sadd.s32 1, %s5887_s20 }
 0x16f   : > { %p52_p8 = scmp.ge.s32.totalorder %s50_s25, 2  ;;  %p67_p9 = scmp.eq.s32.totalorder %s5899_s23, 0 }
 0x170   : > { %s6738_s30 = sadd.s32 4294967295, %s5899_s23   ;;  %p396_p13 = scmp.eq.s32.totalorder %s4172_s0, 1 }
 0x171   : > { %p66_p7 = scmp.ne.s32.totalorder %s5887_s20, %s6734_s1  ;;  %s6764_s25 = smov (%p52_p8, %s50_s25), 0 }
 0x172   : > { %p72_p1 = scmp.ne.s32.totalorder %s6734_s1, %s6735_s29  ;;  %s54_s18 = ssub.s32 %s5895_s22, %s6764_s25 }
 0x173   : > { %p6387_p4 = por %p67_p9, %p66_p7  ;;  %p390_p6 = scmp.eq.s32.totalorder %s6738_s30, 1 }
 0x174   : > { %p57_p3 = scmp.eq.s32.totalorder %s54_s18, 0  ;;  %p6739_p10 = scmp.ne.s32.totalorder %s6736_s28, 0 }
 0x175   : > { %p6403_p12 = por %p390_p6, %p66_p7  ;;  %p6410_p0 = por %p396_p13, %p72_p1 }
 0x176   : > { %p6399_p11 = por %p6739_p10, %p72_p1  ;;  %p4765_p2 = scmp.lt.s32.totalorder %s5899_s23, 2 }
 0x177   : > { %s6741_s27 = scalar_select %p6403_p12, 1, 0 }
 0x178   : > { %s6408_s26 = scalar_select %p57_p3, %s5887_s20, %s59_s16  }
 0x179   : > { %s6742_s21 = scalar_select %p6410_p0, 1, 0 }
 0x17a   : > { %s582_s24 = sand.u32 1, %s5887_s20   ;;  %s4568_s15 = sshll.u32 %s5895_s22, 9 }
 0x17b   : > { %s4189_s17 = sshll.u32 %s582_s24, 5  ;;  %s6743_s28 = sld [smem:[#allocation42_spill]] }
 0x17c   : > { %s586_s0 = scalar_lea.vmem [#allocation3], %s4189_s17  ;;  %p6424_p5 = pnand %p4765_p2, %p6387_p4 }
 0x17d   : > { %s595_s16 = sshll.u32 %s586_s0, 4  ;;  %s6430_s2 = scalar_lea.sflag [#allocation4], %s582_s24  ;;  %s6428_s16 = int_to_ptr.vmem [resolvable:$true] %s595_s16 }
 0x17e   : > { %p5761_p7 = pneg %p6424_p5 }
 0x181   : > { %s6420_s18 = scalar_lea.hbm %s6743_s28, %s4568_s15  ;;  %s5764_s17 = scalar_lea.hbm %s6743_s28, 1024 }
 0x182   : > { %s5759_s1 = scalar_lea.hbm %s6420_s18, 512  ;;  %p5765_p4 = scmp.lt.u32.totalorder %s6420_s18, %s6743_s28 }
 0x183   : > { %p5760_p8 = scmp.ne.s32.totalorder %s6420_s18, %s5759_s1  ;;  %p5766_p6 = scmp.lt.u32.totalorder %s5764_s17, %s5759_s1 }
 0x184   : > { %p5768_p10 = scmp.lt.u32.totalorder %s5759_s1, %s6420_s18 }
 0x185   : > { %p5762_p9 = pnand %p5761_p7, %p5760_p8  ;;  %p5767_p3 = por %p5766_p6, %p5765_p4 }
 0x187   : > { %p5763_p1 = pneg %p5762_p9  ;;  %p5769_p13 = por %p5768_p10, %p5767_p3 }
 0x189   : > { %p5770_p2 = pnand %p5769_p13, %p5763_p1 }
 0x18b   : > { %5773 = shalt.err (!%p5770_p2)
}
 0x18c   : > { %s5774_s24 = scalar_lea.vmem %s6428_s16, 512  ;;  %s5921_s15 = smov [#allocation3]  }
 0x18d   : > { %p5775_p8 = scmp.ne.s32.totalorder %s6428_s16, %s5774_s24  ;;  %s5779_s19 = sshll.u32 %s5921_s15, 4  ;;  %s5780_s19 = int_to_ptr.vmem [resolvable:$false] %s5779_s19 }
 0x18e   : > { %s5781_s29 = scalar_lea.vmem %s5780_s19, 1024  ;;  %p5782_p12 = scmp.lt.s32.totalorder %s6428_s16, %s5780_s19 }
 0x18f   : > { %p5777_p9 = pnand %p5775_p8, %p5761_p7  ;;  %p5783_p4 = scmp.lt.s32.totalorder %s5781_s29, %s5774_s24 }
 0x191   : > { %p5778_p0 = pneg %p5777_p9  ;;  %p5784_p6 = por %p5783_p4, %p5782_p12 }
 0x193   : > { %p5785_p3 = pnand %p5784_p6, %p5778_p0 }
 0x195   : > { %5788 = shalt.err (!%p5785_p3)
}
 0x196   : > { %s6745_s1 = smov 4   ;;  %s6746_s17 = smov 64  }
 0x197   : > { %4746 = dma.hbm_to_vmem [thread:$0]  (!%p6424_p5), %s6420_s18, 512, %s6428_s16, %s6430_s2, %s6746_s17, %s6746_s17, %s6745_s1  }
 0x198   : > { %s6747_s0 = sld [smem:[#allocation41_spill]] }
 0x19e   : > { %p6748_p7 = scmp.ne.s32.totalorder %s6747_s0, 0 }
 0x19f   : > { %s6749_s15 = sld [smem:[#allocation38_spill]] (!%p6748_p7) }
 0x1a0   : > { %607 = sbr.rel (%p6748_p7) target bundleno = 2243 (0x8c3), region = 80 }
 0x1a5   : > { %s6464_s4 = sand.u32 (!%p6748_p7), 1, %s6749_s15  }
 0x1a6   : > { %s4193_s24 = sshll.u32 (!%p6748_p7), %s6464_s4, 5  ;;  %s610_s19 = scalar_lea.sflag (!%p6748_p7), [#allocation4], %s6464_s4 }
 0x1a7   : > { %s6468_s29 = scalar_lea.vmem [#allocation3], %s4193_s24 }
 0x1a8   : > { %5842 = dma.done.wait (%p6399_p11), %s610_s19, 512  }
 0x1a9   : > { %5844 = vsyncadd (%p6399_p11), %s610_s19, 4294966784  ;;  %s6750_s30 = sld [smem:[#allocation40_spill]] }
 0x1af   : > { %p6751_p12 = scmp.ne.s32.totalorder %s6750_s30, 0 }
 0x1b1   : > { %5846 = dma.done.wait (%p6751_p12), [#allocation7], 80  }
 0x1b2   : > { %5848 = vsyncadd (%p6751_p12), [#allocation7], 4294967216 }
 0x1b3   : > { %5850 = dma.done.wait (%p6751_p12), [#allocation10], 1040  }
 0x1b4   : > { %5852 = vsyncadd (%p6751_p12), [#allocation10], 4294966256 }
 0x1b5   : > { %5854 = dma.done.wait (%p6751_p12), [#allocation13], 2080  }
 0x1b6   : > { %5856 = vsyncadd (%p6751_p12), [#allocation13], 4294965216 }
 0x1b7   : > { %5858 = dma.done.wait (%p6751_p12), [#allocation16], 8256  }
 0x1b8   : > { %5860 = vsyncadd (%p6751_p12), [#allocation16], 4294959040 }
 0x1b9   : > { %5862 = dma.done.wait (%p6751_p12), [#allocation19], 16448  }
 0x1ba   : > { %5864 = vsyncadd (%p6751_p12), [#allocation19], 4294950848 }
 0x1bb   : > { %5866 = dma.done.wait (%p6751_p12), [#allocation22], 8224  }
 0x1bc   : > { %5868 = vsyncadd (%p6751_p12), [#allocation22], 4294959072 }
 0x1bd   : > { %5870 = dma.done.wait (%p6751_p12), [#allocation25], 8256  }
 0x1be   : > { %5872 = vsyncadd (%p6751_p12), [#allocation25], 4294959040  ;;  %vm803_vm0 = vcmask 1043456   ;;  %vm790_vm1 = vcmask 64512   ;;  %v762_v0 = vld [vmem:[#allocation6] sm:$0xf] }
 0x1bf   : > { %4639 = vmatprep.subr.msk.bf16.mxu0 %vm803_vm0, %v762_v0  ;;  %v805_v1 = vsel %vm803_vm0, %v762_v0, 0  ;;  %v4851_v2 = vld [vmem:[%s6468_s29] sm:$0xff]   ;;  %v4852_v3 = vld [vmem:[%s6468_s29 + $0x8] sm:$0xff]   ;;  %v4853_v4 = vld [vmem:[%s6468_s29 + $0x10] sm:$0xff]   ;;  %v5922_v59 = vmov 0   ;;  %s6752_s2 = sld [smem:[#allocation39_spill]] }
 0x1c0   : > { %4588 = vmatpush3.bf16.msra.mxu0 %v805_v1  ;;  %4589 = vmatprep.mubr.msk.bf16.mxu0 %vm790_vm1, %v4851_v2  ;;  %v4855_v5 = vld [vmem:[#allocation9] sm:$0xff]   ;;  %v4856_v6 = vld [vmem:[#allocation9 + $0x8] sm:$0xff]   ;;  %v4854_v7 = vld [vmem:[%s6468_s29 + $0x18] sm:$0xff]   ;;  %s4208_s3 = sshll.u32 %s6464_s4, 2  ;;  %s6753_s15 = sld [smem:[#allocation47_spill]] }
 0x1c1   : > { %4597 = vmatprep.subr.bf16.mxu1 %v4855_v5  ;;  %v4857_v8 = vld [vmem:[#allocation9 + $0x10] sm:$0xff]   ;;  %v4858_v9 = vld [vmem:[#allocation9 + $0x18] sm:$0xff]   ;;  %v4859_v10 = vld [vmem:[#allocation9 + $0x20] sm:$0xff]   ;;  %s715_s16 = scalar_lea.vmem [#allocation27], %s4208_s3  ;;  %s3943_s19 = scalar_lea.sflag [#allocation5], %s6464_s4 }
 0x1c2   : > { %4598 = vmatpush3.bf16.msra.mxu1 %v4855_v5  ;;  %v4860_v11 = vld [vmem:[#allocation9 + $0x28] sm:$0xff]   ;;  %v4861_v12 = vld [vmem:[#allocation9 + $0x30] sm:$0xff]   ;;  %v4862_v13 = vld [vmem:[#allocation9 + $0x38] sm:$0xff]   ;;  %s3957_s1 = sshll.u32 %s715_s16, 4  ;;  %p6754_p0 = scmp.ne.s32.totalorder %s6741_s27, 0  ;;  %s6631_s1 = int_to_ptr.vmem [resolvable:$true] %s3957_s1 }
 0x1c3   : > { %4590 = vmatmul.mubr.msk.bf16.vlgmr.msra.gmra.mrb[0].mxu0 %vm790_vm1, %v4852_v3  ;;  %4599 = vmatprep.subr.bf16.mxu1 %v4856_v6  ;;  %v4863_v14 = vld [vmem:[#allocation12] ss:$8 sps:$4 sm:$0xff]   ;;  %v4865_v15 = vld [vmem:[#allocation12 + $0x4] ss:$8 sps:$4 sm:$0xff]   ;;  %v4868_v16 = vld [vmem:[#allocation12 + $0x14] ss:$8 sps:$4 sm:$0xff]  }
 0x1c4   : > { %4593 = vmatprep.mubr.msk.bf16.mxu0 %vm790_vm1, %v4853_v4  ;;  %1140 = vmatprep.subr.bf16.mxu0 %v4865_v15  ;;  %v4866_v17 = vld [vmem:[#allocation12 + $0x10] ss:$8 sps:$4 sm:$0xff]   ;;  %v4871_v18 = vld [vmem:[#allocation12 + $0x24] ss:$8 sps:$4 sm:$0xff]   ;;  %v4869_v19 = vld [vmem:[#allocation12 + $0x20] ss:$8 sps:$4 sm:$0xff]  }
 0x1c5   : > { %1141 = vmatpush1.bf16.msra.mxu0 %v4863_v14  ;;  %v4874_v20 = vld [vmem:[#allocation12 + $0x34] ss:$8 sps:$4 sm:$0xff]   ;;  %v4872_v21 = vld [vmem:[#allocation12 + $0x30] ss:$8 sps:$4 sm:$0xff]   ;;  %v4877_v22 = vld [vmem:[#allocation12 + $0x44] ss:$8 sps:$4 sm:$0xff]  }
 0x1c6   : > { %4600 = vmatpush3.bf16.msra.mxu1 %v4856_v6  ;;  %1142 = vmatprep.subr.bf16.mxu0 %v4868_v16  ;;  %v4875_v23 = vld [vmem:[#allocation12 + $0x40] ss:$8 sps:$4 sm:$0xff]   ;;  %v4880_v24 = vld [vmem:[#allocation12 + $0x54] ss:$8 sps:$4 sm:$0xff]   ;;  %v4878_v25 = vld [vmem:[#allocation12 + $0x50] ss:$8 sps:$4 sm:$0xff]  }
 0x1c7   : > { %4601 = vmatprep.subr.bf16.mxu1 %v4857_v8  ;;  %v4209_v26 = vld [vmem:[#allocation8] ss:$0 sm:$0xff]  ;;  %v4883_v55 = vld [vmem:[#allocation12 + $0x64] ss:$8 sps:$4 sm:$0xff]   ;;  %v4881_v56 = vld [vmem:[#allocation12 + $0x60] ss:$8 sps:$4 sm:$0xff]  }
 0x1c8   : > { %v4886_v57 = vld [vmem:[#allocation12 + $0x74] ss:$8 sps:$4 sm:$0xff]   ;;  %v4884_v58 = vld [vmem:[#allocation12 + $0x70] ss:$8 sps:$4 sm:$0xff]   ;;  %s4569_s18 = sshll.u32 %s6752_s2, 6  ;;  %s5789_s29 = scalar_lea.vmem %s6631_s1, 64 }
 0x1c9   : > { %1143 = vmatpush1.bf16.msra.mxu0 %v4866_v17  ;;  %v4887_v60 = vld [vmem:[#allocation15] ss:$16 sps:$4 sm:$0xff]   ;;  %v4889_v61 = vld [vmem:[#allocation15 + $0x4] ss:$16 sps:$4 sm:$0xff]   ;;  %v4892_v62 = vld [vmem:[#allocation15 + $0xc] ss:$16 sps:$4 sm:$0xff]   ;;  %s6629_s24 = scalar_lea.hbm %s6753_s15, %s4569_s18  ;;  %p5790_p11 = scmp.ne.s32.totalorder %s6631_s1, %s5789_s29 }
 0x1ca   : > { %4602 = vmatpush3.bf16.msra.mxu1 %v4857_v8  ;;  %1144 = vmatprep.subr.bf16.mxu0 %v4871_v18  ;;  %v4895_v63 = vld [vmem:[#allocation15 + $0x24] ss:$16 sps:$4 sm:$0xff]   ;;  %v4893_v0 = vld [vmem:[#allocation15 + $0x20] ss:$16 sps:$4 sm:$0xff]   ;;  %s5924_s30 = smov [#allocation27]  }
 0x1cb   : > { %4594 = vmatmul.mubr.msk.bf16.gmra.mrb[4].mxu0 %vm790_vm1, %v4854_v7  ;;  %4603 = vmatprep.subr.bf16.mxu1 %v4858_v9  ;;  %v4901_v1 = vld [vmem:[#allocation15 + $0x44] ss:$16 sps:$4 sm:$0xff]   ;;  %v4899_v2 = vld [vmem:[#allocation15 + $0x40] ss:$16 sps:$4 sm:$0xff]   ;;  %p5791_p5 = pnand %p5790_p11, %p6754_p0  ;;  %s5793_s2 = sshll.u32 %s5924_s30, 4  ;;  %s5794_s2 = int_to_ptr.vmem [resolvable:$false] %s5793_s2 }
 0x1cc   : > { %1172 = vmatprep.mubr.bf16.mxu0 %v5922_v59  ;;  %v4907_v3 = vld [vmem:[#allocation15 + $0x64] ss:$16 sps:$4 sm:$0xff]   ;;  %v4905_v4 = vld [vmem:[#allocation15 + $0x60] ss:$16 sps:$4 sm:$0xff]   ;;  %s5795_s3 = scalar_lea.vmem %s5794_s2, 128  ;;  %p5796_p10 = scmp.lt.s32.totalorder %s6631_s1, %s5794_s2 }
 0x1cd   : > { %1145 = vmatpush1.bf16.msra.mxu0 %v4869_v19  ;;  %v4913_v5 = vld [vmem:[#allocation15 + $0x84] ss:$16 sps:$4 sm:$0xff]   ;;  %v4911_v6 = vld [vmem:[#allocation15 + $0x80] ss:$16 sps:$4 sm:$0xff]   ;;  %p5792_p1 = pneg %p5791_p5  ;;  %p5797_p13 = scmp.lt.s32.totalorder %s5795_s3, %s5789_s29 }
 0x1ce   : > { %4604 = vmatpush3.bf16.msra.mxu1 %v4858_v9  ;;  %1146 = vmatprep.subr.bf16.mxu0 %v4874_v20  ;;  %v4919_v7 = vld [vmem:[#allocation15 + $0xa4] ss:$16 sps:$4 sm:$0xff]   ;;  %v4917_v8 = vld [vmem:[#allocation15 + $0xa0] ss:$16 sps:$4 sm:$0xff]  }
 0x1cf   : > { %4605 = vmatprep.subr.bf16.mxu1 %v4859_v10  ;;  %v4925_v9 = vld [vmem:[#allocation15 + $0xc4] ss:$16 sps:$4 sm:$0xff]   ;;  %v4935_v14 = vld [vmem:[#allocation15 + $0x100] ss:$16 sps:$4 sm:$0xff]   ;;  %p5798_p2 = por %p5797_p13, %p5796_p10 }
 0x1d0   : > { %v4943_v15 = vld [vmem:[#allocation15 + $0x124] ss:$16 sps:$4 sm:$0xff]   ;;  %v4941_v16 = vld [vmem:[#allocation15 + $0x120] ss:$16 sps:$4 sm:$0xff]  }
 0x1d1   : > { %1147 = vmatpush1.bf16.msra.mxu0 %v4872_v21  ;;  %v4949_v17 = vld [vmem:[#allocation15 + $0x144] ss:$16 sps:$4 sm:$0xff]   ;;  %v4947_v18 = vld [vmem:[#allocation15 + $0x140] ss:$16 sps:$4 sm:$0xff]   ;;  %p5799_p8 = pnand %p5798_p2, %p5792_p1 }
 0x1d2   : > { %4606 = vmatpush3.bf16.msra.mxu1 %v4859_v10  ;;  %1148 = vmatprep.subr.bf16.mxu0 %v4877_v22  ;;  %v4923_v10 = vld [vmem:[#allocation15 + $0xc0] ss:$16 sps:$4 sm:$0xff]   ;;  %v4955_v19 = vld [vmem:[#allocation15 + $0x164] ss:$16 sps:$4 sm:$0xff]  }
 0x1d3   : > { %4607 = vmatprep.subr.bf16.mxu1 %v4860_v11  ;;  %v4953_v20 = vld [vmem:[#allocation15 + $0x160] ss:$16 sps:$4 sm:$0xff]   ;;  %v4961_v21 = vld [vmem:[#allocation15 + $0x184] ss:$16 sps:$4 sm:$0xff]  }
 0x1d4   : > { %v4959_v22 = vld [vmem:[#allocation15 + $0x180] ss:$16 sps:$4 sm:$0xff]  }
 0x1d5   : > { %1149 = vmatpush1.bf16.msra.mxu0 %v4875_v23  ;;  %v4967_v23 = vld [vmem:[#allocation15 + $0x1a4] ss:$16 sps:$4 sm:$0xff]  }
 0x1d6   : > { %4608 = vmatpush3.bf16.msra.mxu1 %v4860_v11  ;;  %1150 = vmatprep.subr.bf16.mxu0 %v4880_v24  ;;  %v4931_v11 = vld [vmem:[#allocation15 + $0xe4] ss:$16 sps:$4 sm:$0xff]   ;;  %v4965_v24 = vld [vmem:[#allocation15 + $0x1a0] ss:$16 sps:$4 sm:$0xff]  }
 0x1d7   : > { %4609 = vmatprep.subr.bf16.mxu1 %v4861_v12 }
 0x1d9   : > { %1151 = vmatpush1.bf16.msra.mxu0 %v4878_v25  ;;  %v4218_v25 = vld [vmem:[#allocation11] ss:$0 sm:$0xff] }
 0x1da   : > { %4610 = vmatpush3.bf16.msra.mxu1 %v4861_v12  ;;  %1152 = vmatprep.subr.bf16.mxu0 %v4883_v55  ;;  %v4929_v12 = vld [vmem:[#allocation15 + $0xe0] ss:$16 sps:$4 sm:$0xff]  }
 0x1db   : > { %4611 = vmatprep.subr.bf16.mxu1 %v4862_v13 }
 0x1dd   : > { %1153 = vmatpush1.bf16.msra.mxu0 %v4881_v56 }
 0x1de   : > { %4612 = vmatpush3.bf16.msra.mxu1 %v4862_v13  ;;  %1154 = vmatprep.subr.bf16.mxu0 %v4886_v57  ;;  %v4937_v13 = vld [vmem:[#allocation15 + $0x104] ss:$16 sps:$4 sm:$0xff]   ;;  %v4902_v57 = vld [vmem:[#allocation15 + $0x48] ss:$16 sps:$4 sm:$0xff]  }
 0x1df   : > { %1643 = vmatprep.subr.bf16.mxu1 %v4889_v61  ;;  %v4908_v61 = vld [vmem:[#allocation15 + $0x68] ss:$16 sps:$4 sm:$0xff]  }
 0x1e1   : > { %1155 = vmatpush1.bf16.msra.mxu0 %v4884_v58 }
 0x1e2   : > { %1716 = vmatprep.subr.bf16.mxu0 %v4892_v62  ;;  %v4916_v62 = vld [vmem:[#allocation15 + $0x8c] ss:$16 sps:$4 sm:$0xff]  }
 0x296   : > { %v4591_v27 = vpop.f32.mrb[0].mxu0 }
 0x297   : > { %v850_v28 = vadd.f32 %v4591_v27, %v4209_v26  ;;  %v841_v29 = vpop.f32.mrb[1].mxu0 }
 0x298   : > { %v842_v30 = vadd.f32 %v4209_v26, %v841_v29  ;;  %v4592_v31 = vpop.f32.mrb[2].mxu0 }
 0x299   : > { %v853_v32 = vadd.f32 %v4592_v31, %v4209_v26  ;;  %v844_v33 = vpop.f32.mrb[3].mxu0  ;;  %v874_v35 = vmax.f32 %v850_v28, 0.0 }
 0x29a   : > { %v845_v34 = vadd.f32 %v4209_v26, %v844_v33  ;;  %v872_v37 = vmax.f32 %v842_v30, 0.0 }
 0x29b   : > { %v875_v36 = vmax.f32 %v853_v32, 0.0 }
 0x29c   : > { %v873_v38 = vmax.f32 %v845_v34, 0.0 }
 0x29d   : > { %v881_v39 = vpack.c.bf16 %v875_v36, %v874_v35 }
 0x29e   : > { %v4595_v40 = vpop.f32.mrb[4].mxu0  ;;  %v880_v41 = vpack.c.bf16 %v873_v38, %v872_v37 }
 0x29f   : > { %v866_v42 = vadd.f32 %v4595_v40, %v4209_v26  ;;  %v857_v43 = vpop.f32.mrb[5].mxu0 }
 0x2a0   : > { %v858_v44 = vadd.f32 %v4209_v26, %v857_v43  ;;  %4613 = vmatprep.mubr.bf16.mxu1 %v880_v41  ;;  %v4596_v45 = vpop.f32.mrb[6].mxu0 }
 0x2a1   : > { %v878_v46 = vmax.f32 %v866_v42, 0.0  ;;  %v869_v47 = vadd.f32 %v4596_v45, %v4209_v26  ;;  %4614 = vmatmul.mubr.bf16.vlgmr.msra.gmra.mrb[0].mxu1 %v881_v39  ;;  %v860_v48 = vpop.f32.mrb[7].mxu0  ;;  %v4890_v39 = vld [vmem:[#allocation15 + $0x8] ss:$16 sps:$4 sm:$0xff]   ;;  %v4898_v42 = vld [vmem:[#allocation15 + $0x2c] ss:$16 sps:$4 sm:$0xff]  }
 0x2a2   : > { %v876_v49 = vmax.f32 %v858_v44, 0.0  ;;  %v861_v50 = vadd.f32 %v4209_v26, %v860_v48  ;;  %1644 = vmatpush1.bf16.msra.mxu1 %v4887_v60  ;;  %v4910_v60 = vld [vmem:[#allocation15 + $0x6c] ss:$16 sps:$4 sm:$0xff]  }
 0x2a3   : > { %v879_v51 = vmax.f32 %v869_v47, 0.0  ;;  %1645 = vmatprep.subr.bf16.mxu1 %v4895_v63  ;;  %v4914_v63 = vld [vmem:[#allocation15 + $0x88] ss:$16 sps:$4 sm:$0xff]  }
 0x2a4   : > { %v877_v52 = vmax.f32 %v861_v50, 0.0  ;;  %v4896_v50 = vld [vmem:[#allocation15 + $0x28] ss:$16 sps:$4 sm:$0xff]  }
 0x2a5   : > { %v883_v53 = vpack.c.bf16 %v879_v51, %v878_v46 }
 0x2a6   : > { %v882_v54 = vpack.c.bf16 %v877_v52, %v876_v49  ;;  %1646 = vmatpush1.bf16.msra.mxu1 %v4893_v0  ;;  %v4922_v0 = vld [vmem:[#allocation15 + $0xac] ss:$16 sps:$4 sm:$0xff]  }
 0x2a7   : > { %1647 = vmatprep.subr.bf16.mxu1 %v4901_v1  ;;  %v4920_v1 = vld [vmem:[#allocation15 + $0xa8] ss:$16 sps:$4 sm:$0xff]  }
 0x2a8   : > { %4617 = vmatprep.mubr.bf16.mxu1 %v882_v54 }
 0x2a9   : > { %4618 = vmatmul.mubr.bf16.gmra.mrb[4].mxu1 %v883_v53  ;;  %v4904_v53 = vld [vmem:[#allocation15 + $0x4c] ss:$16 sps:$4 sm:$0xff]  }
 0x2aa   : > { %1648 = vmatpush1.bf16.msra.mxu1 %v4899_v2  ;;  %v4928_v2 = vld [vmem:[#allocation15 + $0xcc] ss:$16 sps:$4 sm:$0xff]  }
 0x2ab   : > { %1649 = vmatprep.subr.bf16.mxu1 %v4907_v3  ;;  %v4926_v3 = vld [vmem:[#allocation15 + $0xc8] ss:$16 sps:$4 sm:$0xff]  }
 0x2ae   : > { %1650 = vmatpush1.bf16.msra.mxu1 %v4905_v4  ;;  %v4934_v4 = vld [vmem:[#allocation15 + $0xec] ss:$16 sps:$4 sm:$0xff]  }
 0x2af   : > { %1651 = vmatprep.subr.bf16.mxu1 %v4913_v5  ;;  %v4932_v5 = vld [vmem:[#allocation15 + $0xe8] ss:$16 sps:$4 sm:$0xff]  }
 0x2b2   : > { %1652 = vmatpush1.bf16.msra.mxu1 %v4911_v6  ;;  %v4940_v6 = vld [vmem:[#allocation15 + $0x10c] ss:$16 sps:$4 sm:$0xff]  }
 0x2b3   : > { %1653 = vmatprep.subr.bf16.mxu1 %v4919_v7  ;;  %v4938_v7 = vld [vmem:[#allocation15 + $0x108] ss:$16 sps:$4 sm:$0xff]  }
 0x2b6   : > { %1654 = vmatpush1.bf16.msra.mxu1 %v4917_v8  ;;  %v4946_v8 = vld [vmem:[#allocation15 + $0x12c] ss:$16 sps:$4 sm:$0xff]  }
 0x2b7   : > { %1655 = vmatprep.subr.bf16.mxu1 %v4925_v9  ;;  %v4944_v9 = vld [vmem:[#allocation15 + $0x128] ss:$16 sps:$4 sm:$0xff]  }
 0x2ba   : > { %1656 = vmatpush1.bf16.msra.mxu1 %v4923_v10  ;;  %v4950_v10 = vld [vmem:[#allocation15 + $0x148] ss:$16 sps:$4 sm:$0xff]  }
 0x2bb   : > { %1657 = vmatprep.subr.bf16.mxu1 %v4931_v11  ;;  %v4958_v11 = vld [vmem:[#allocation15 + $0x16c] ss:$16 sps:$4 sm:$0xff]  }
 0x2be   : > { %1658 = vmatpush1.bf16.msra.mxu1 %v4929_v12  ;;  %v4956_v12 = vld [vmem:[#allocation15 + $0x168] ss:$16 sps:$4 sm:$0xff]  }
 0x2bf   : > { %1659 = vmatprep.subr.bf16.mxu1 %v4937_v13  ;;  %v4964_v13 = vld [vmem:[#allocation15 + $0x18c] ss:$16 sps:$4 sm:$0xff]  }
 0x2c2   : > { %1660 = vmatpush1.bf16.msra.mxu1 %v4935_v14  ;;  %v4962_v14 = vld [vmem:[#allocation15 + $0x188] ss:$16 sps:$4 sm:$0xff]  }
 0x2c3   : > { %1661 = vmatprep.subr.bf16.mxu1 %v4943_v15  ;;  %v4970_v15 = vld [vmem:[#allocation15 + $0x1ac] ss:$16 sps:$4 sm:$0xff]  }
 0x2c6   : > { %1662 = vmatpush1.bf16.msra.mxu1 %v4941_v16  ;;  %v4968_v16 = vld [vmem:[#allocation15 + $0x1a8] ss:$16 sps:$4 sm:$0xff]  }
 0x2c7   : > { %1663 = vmatprep.subr.bf16.mxu1 %v4949_v17  ;;  %v4973_v17 = vld [vmem:[#allocation15 + $0x1c4] ss:$16 sps:$4 sm:$0xff]  }
 0x2ca   : > { %1664 = vmatpush1.bf16.msra.mxu1 %v4947_v18  ;;  %v4976_v18 = vld [vmem:[#allocation15 + $0x1cc] ss:$16 sps:$4 sm:$0xff]  }
 0x2cb   : > { %1665 = vmatprep.subr.bf16.mxu1 %v4955_v19  ;;  %v4971_v19 = vld [vmem:[#allocation15 + $0x1c0] ss:$16 sps:$4 sm:$0xff]  }
 0x2ce   : > { %1666 = vmatpush1.bf16.msra.mxu1 %v4953_v20  ;;  %v4974_v20 = vld [vmem:[#allocation15 + $0x1c8] ss:$16 sps:$4 sm:$0xff]  }
 0x2cf   : > { %1667 = vmatprep.subr.bf16.mxu1 %v4961_v21  ;;  %v4979_v21 = vld [vmem:[#allocation15 + $0x1e4] ss:$16 sps:$4 sm:$0xff]  }
 0x2d2   : > { %1668 = vmatpush1.bf16.msra.mxu1 %v4959_v22  ;;  %v4982_v22 = vld [vmem:[#allocation15 + $0x1ec] ss:$16 sps:$4 sm:$0xff]  }
 0x2d3   : > { %1669 = vmatprep.subr.bf16.mxu1 %v4967_v23  ;;  %v4977_v23 = vld [vmem:[#allocation15 + $0x1e0] ss:$16 sps:$4 sm:$0xff]  }
 0x2d6   : > { %1670 = vmatpush1.bf16.msra.mxu1 %v4965_v24  ;;  %v4980_v24 = vld [vmem:[#allocation15 + $0x1e8] ss:$16 sps:$4 sm:$0xff]  }
 0x2d7   : > { %1671 = vmatprep.subr.bf16.mxu1 %v4973_v17 }
 0x2da   : > { %1672 = vmatpush1.bf16.msra.mxu1 %v4971_v19  ;;  %v5004_v19 = vld [vmem:[#allocation18 + $0x68] ss:$16 sps:$4 sm:$0xff]  }
 0x2db   : > { %1673 = vmatprep.subr.bf16.mxu1 %v4979_v21 }
 0x2de   : > { %1674 = vmatpush1.bf16.msra.mxu1 %v4977_v23  ;;  %v5012_v23 = vld [vmem:[#allocation18 + $0x8c] ss:$16 sps:$4 sm:$0xff]  }
 0x374   : > { %v4615_v26 = vpop.f32.mrb[0].mxu1 }
 0x375   : > { %v998_v27 = vadd.f32 %v4615_v26, %v4218_v25  ;;  %v989_v28 = vpop.f32.mrb[1].mxu1  ;;  %v4988_v26 = vld [vmem:[#allocation18 + $0xc] ss:$16 sps:$4 sm:$0xff]  }
 0x376   : > { %v990_v29 = vadd.f32 %v4218_v25, %v989_v28  ;;  %v4616_v30 = vpop.f32.mrb[2].mxu1 }
 0x377   : > { %v1001_v31 = vadd.f32 %v4616_v30, %v4218_v25  ;;  %v992_v32 = vpop.f32.mrb[3].mxu1  ;;  %v1022_v34 = vmax.f32 %v998_v27, 0.0  ;;  %v1050_v27 = vlaneseq  ;;  %v1048_v30 = vld [vmem:[#allocation14] sm:$0x3] }
 0x378   : > { %v993_v33 = vadd.f32 %v4218_v25, %v992_v32  ;;  %v1020_v36 = vmax.f32 %v990_v29, 0.0 }
 0x379   : > { %v1023_v35 = vmax.f32 %v1001_v31, 0.0  ;;  %v6515_v28 = vshrl.u32 %v1050_v27, 7  ;;  %vm3939_vm2 = vcmp.lt.s32.totalorder %v1050_v27, 512 }
 0x37a   : > { %v1021_v37 = vmax.f32 %v993_v33, 0.0 }
 0x37b   : > { %v1029_v38 = vpack.c.bf16 %v1023_v35, %v1022_v34  ;;  %v6518_v29 = vsub.s32 0, %v6515_v28  ;;  %v6521_v31 = vsub.s32 1, %v6515_v28 }
 0x37c   : > { %v1028_v40 = vpack.c.bf16 %v1021_v37, %v1020_v36  ;;  %v4619_v41 = vpop.f32.mrb[4].mxu1 }
 0x37d   : > { %v1014_v43 = vadd.f32 %v4619_v41, %v4218_v25  ;;  %v1005_v44 = vpop.f32.mrb[5].mxu1  ;;  %v6524_v32 = vrot.slane %v1048_v30, %v6518_v29  ;;  %v6527_v33 = vrot.slane %v1048_v30, %v6521_v31 }
 0x37e   : > { %v1006_v45 = vadd.f32 %v4218_v25, %v1005_v44  ;;  %1173 = vmatmul.mubr.bf16.vlgmr.msra.gmra.mrb[8].mxu0 %v1028_v40  ;;  %v4620_v46 = vpop.f32.mrb[6].mxu1 }
 0x37f   : > { %v1026_v47 = vmax.f32 %v1014_v43, 0.0  ;;  %v1017_v48 = vadd.f32 %v4620_v46, %v4218_v25  ;;  %v1008_v49 = vpop.f32.mrb[7].mxu1  ;;  %1182 = vmatprep.mubr.bf16.mxu0 %v5922_v59  ;;  %1717 = vmatpush1.bf16.msra.mxu0 %v4890_v39 }
 0x380   : > { %v1024_v51 = vmax.f32 %v1006_v45, 0.0  ;;  %v1009_v52 = vadd.f32 %v4218_v25, %v1008_v49  ;;  %1718 = vmatprep.subr.bf16.mxu0 %v4898_v42  ;;  %v4985_v25 = vld [vmem:[#allocation18 + $0x4] ss:$16 sps:$4 sm:$0xff]   ;;  %v4983_v49 = vld [vmem:[#allocation18] ss:$16 sps:$4 sm:$0xff]  }
 0x381   : > { %v1027_v54 = vmax.f32 %v1017_v48, 0.0  ;;  %2766 = vmatprep.subr.bf16.mxu1 %v4985_v25 }
 0x382   : > { %v1025_v55 = vmax.f32 %v1009_v52, 0.0 }
 0x383   : > { %v1031_v56 = vpack.c.bf16 %v1027_v54, %v1026_v47  ;;  %1719 = vmatpush1.bf16.msra.mxu0 %v4896_v50  ;;  %v4986_v50 = vld [vmem:[#allocation18 + $0x8] ss:$16 sps:$4 sm:$0xff]   ;;  %v4994_v54 = vld [vmem:[#allocation18 + $0x2c] ss:$16 sps:$4 sm:$0xff]  }
 0x384   : > { %v1030_v58 = vpack.c.bf16 %v1025_v55, %v1024_v51  ;;  %1720 = vmatprep.subr.bf16.mxu0 %v4904_v53  ;;  %v4991_v53 = vld [vmem:[#allocation18 + $0x24] ss:$16 sps:$4 sm:$0xff]  }
 0x386   : > { %1183 = vmatmul.mubr.bf16.gmra.mrb[12].mxu0 %v1029_v38 }
 0x387   : > { %1192 = vmatprep.mubr.bf16.mxu0 %v5922_v59  ;;  %1721 = vmatpush1.bf16.msra.mxu0 %v4902_v57 }
 0x388   : > { %1722 = vmatprep.subr.bf16.mxu0 %v4910_v60 }
 0x38b   : > { %1723 = vmatpush1.bf16.msra.mxu0 %v4908_v61  ;;  %v4989_v61 = vld [vmem:[#allocation18 + $0x20] ss:$16 sps:$4 sm:$0xff]  }
 0x38c   : > { %1724 = vmatprep.subr.bf16.mxu0 %v4916_v62  ;;  %v4992_v62 = vld [vmem:[#allocation18 + $0x28] ss:$16 sps:$4 sm:$0xff]  }
 0x38e   : > { %1193 = vmatmul.mubr.bf16.gmra.mrb[16].mxu0 %v1030_v58 }
 0x38f   : > { %1202 = vmatprep.mubr.bf16.mxu0 %v5922_v59  ;;  %1725 = vmatpush1.bf16.msra.mxu0 %v4914_v63  ;;  %v4952_v59 = vld [vmem:[#allocation15 + $0x14c] ss:$16 sps:$4 sm:$0xff]  }
 0x390   : > { %1726 = vmatprep.subr.bf16.mxu0 %v4922_v0 }
 0x393   : > { %1727 = vmatpush1.bf16.msra.mxu0 %v4920_v1  ;;  %v4997_v1 = vld [vmem:[#allocation18 + $0x44] ss:$16 sps:$4 sm:$0xff]  }
 0x394   : > { %1728 = vmatprep.subr.bf16.mxu0 %v4928_v2  ;;  %v5000_v2 = vld [vmem:[#allocation18 + $0x4c] ss:$16 sps:$4 sm:$0xff]  }
 0x396   : > { %1203 = vmatmul.mubr.bf16.gmra.mrb[20].mxu0 %v1031_v56 }
 0x397   : > { %1729 = vmatpush1.bf16.msra.mxu0 %v4926_v3 }
 0x398   : > { %1730 = vmatprep.subr.bf16.mxu0 %v4934_v4 }
 0x39b   : > { %1731 = vmatpush1.bf16.msra.mxu0 %v4932_v5 }
 0x39c   : > { %1732 = vmatprep.subr.bf16.mxu0 %v4940_v6 }
 0x39f   : > { %1733 = vmatpush1.bf16.msra.mxu0 %v4938_v7 }
 0x3a0   : > { %1734 = vmatprep.subr.bf16.mxu0 %v4946_v8  ;;  %v4995_v8 = vld [vmem:[#allocation18 + $0x40] ss:$16 sps:$4 sm:$0xff]  }
 0x3a3   : > { %1735 = vmatpush1.bf16.msra.mxu0 %v4944_v9  ;;  %v4998_v9 = vld [vmem:[#allocation18 + $0x48] ss:$16 sps:$4 sm:$0xff]  }
 0x3a4   : > { %1736 = vmatprep.subr.bf16.mxu0 %v4952_v59 }
 0x3a7   : > { %1737 = vmatpush1.bf16.msra.mxu0 %v4950_v10 }
 0x3a8   : > { %1738 = vmatprep.subr.bf16.mxu0 %v4958_v11  ;;  %v5003_v11 = vld [vmem:[#allocation18 + $0x64] ss:$16 sps:$4 sm:$0xff]  }
 0x3ab   : > { %1739 = vmatpush1.bf16.msra.mxu0 %v4956_v12  ;;  %v5006_v12 = vld [vmem:[#allocation18 + $0x6c] ss:$16 sps:$4 sm:$0xff]  }
 0x3ac   : > { %1740 = vmatprep.subr.bf16.mxu0 %v4964_v13 }
 0x3af   : > { %1741 = vmatpush1.bf16.msra.mxu0 %v4962_v14 }
 0x3b0   : > { %1742 = vmatprep.subr.bf16.mxu0 %v4970_v15 }
 0x3b3   : > { %1743 = vmatpush1.bf16.msra.mxu0 %v4968_v16 }
 0x3b4   : > { %1744 = vmatprep.subr.bf16.mxu0 %v4976_v18  ;;  %v5001_v18 = vld [vmem:[#allocation18 + $0x60] ss:$16 sps:$4 sm:$0xff]  }
 0x3b7   : > { %1745 = vmatpush1.bf16.msra.mxu0 %v4974_v20 }
 0x3b8   : > { %1746 = vmatprep.subr.bf16.mxu0 %v4982_v22  ;;  %v5009_v22 = vld [vmem:[#allocation18 + $0x84] ss:$16 sps:$4 sm:$0xff]  }
 0x3bb   : > { %1747 = vmatpush1.bf16.msra.mxu0 %v4980_v24 }
 0x3bc   : > { %2848 = vmatprep.subr.bf16.mxu0 %v4988_v26 }
 0x451   : > { %v1174_v34 = vpop.f32.mrb[8].mxu0 }
 0x452   : > { %v1175_v35 = vadd.f32 %v1174_v34, %v6524_v32  ;;  %v1176_v36 = vpop.f32.mrb[9].mxu0 }
 0x453   : > { %v1177_v37 = vadd.f32 %v1176_v36, %v6527_v33  ;;  %v1178_v38 = vpop.f32.mrb[10].mxu0  ;;  %v5010_v36 = vld [vmem:[#allocation18 + $0x88] ss:$16 sps:$4 sm:$0xff]  }
 0x454   : > { %v1179_v39 = vadd.f32 %v1178_v38, %v6524_v32  ;;  %v1180_v40 = vpop.f32.mrb[11].mxu0  ;;  %v1213_v42 = vmax.f32 %v1175_v35, 0.0  ;;  %v5007_v35 = vld [vmem:[#allocation18 + $0x80] ss:$16 sps:$4 sm:$0xff]  }
 0x455   : > { %v1181_v41 = vadd.f32 %v1180_v40, %v6527_v33  ;;  %v1214_v44 = vmax.f32 %v1177_v37, 0.0 }
 0x456   : > { %v1215_v43 = vmax.f32 %v1179_v39, 0.0 }
 0x457   : > { %v1216_v45 = vmax.f32 %v1181_v41, 0.0 }
 0x458   : > { %v1229_v46 = vpack.c.bf16 %v1215_v43, %v1213_v42 }
 0x459   : > { %v1230_v47 = vpack.c.bf16 %v1216_v45, %v1214_v44  ;;  %v1184_v48 = vpop.f32.mrb[12].mxu0 }
 0x45a   : > { %v1185_v51 = vadd.f32 %v1184_v48, %v6524_v32  ;;  %v1186_v52 = vpop.f32.mrb[13].mxu0 }
 0x45b   : > { %v1187_v55 = vadd.f32 %v1186_v52, %v6527_v33  ;;  %v1188_v56 = vpop.f32.mrb[14].mxu0  ;;  %1675 = vmatprep.mubr.bf16.mxu1 %v1230_v47  ;;  %1748 = vmatprep.mubr.bf16.mxu0 %v1230_v47  ;;  %v5016_v52 = vld [vmem:[#allocation18 + $0xa8] ss:$16 sps:$4 sm:$0xff]  }
 0x45c   : > { %v1189_v57 = vadd.f32 %v1188_v56, %v6524_v32  ;;  %v1190_v58 = vpop.f32.mrb[15].mxu0  ;;  %1676 = vmatmul.mubr.bf16.vlgmr.msra.gmra.mrb[8].mxu1 %v1229_v46  ;;  %1749 = vmatmul.mubr.bf16.vlgmr.msra.gmra.mrb[24].mxu0 %v1229_v46  ;;  %v1217_v63 = vmax.f32 %v1185_v51, 0.0  ;;  %v5018_v51 = vld [vmem:[#allocation18 + $0xac] ss:$16 sps:$4 sm:$0xff]   ;;  %v5027_v56 = vld [vmem:[#allocation18 + $0xe4] ss:$16 sps:$4 sm:$0xff]  }
 0x45d   : > { %v1191_v60 = vadd.f32 %v1190_v58, %v6527_v33  ;;  %2767 = vmatpush1.bf16.msra.mxu1 %v4983_v49  ;;  %2849 = vmatpush1.bf16.msra.mxu0 %v4986_v50  ;;  %v1218_v3 = vmax.f32 %v1187_v55, 0.0  ;;  %v5015_v50 = vld [vmem:[#allocation18 + $0xa4] ss:$16 sps:$4 sm:$0xff]   ;;  %v5022_v55 = vld [vmem:[#allocation18 + $0xc8] ss:$16 sps:$4 sm:$0xff]  }
 0x45e   : > { %v1219_v0 = vmax.f32 %v1189_v57, 0.0  ;;  %2768 = vmatprep.subr.bf16.mxu1 %v4991_v53  ;;  %2850 = vmatprep.subr.bf16.mxu0 %v4994_v54  ;;  %v5024_v53 = vld [vmem:[#allocation18 + $0xcc] ss:$16 sps:$4 sm:$0xff]   ;;  %v5019_v54 = vld [vmem:[#allocation18 + $0xc0] ss:$16 sps:$4 sm:$0xff]  }
 0x45f   : > { %v1220_v4 = vmax.f32 %v1191_v60, 0.0  ;;  %v5030_v57 = vld [vmem:[#allocation18 + $0xec] ss:$16 sps:$4 sm:$0xff]   ;;  %v5025_v58 = vld [vmem:[#allocation18 + $0xe0] ss:$16 sps:$4 sm:$0xff]  }
 0x460   : > { %v1231_v5 = vpack.c.bf16 %v1219_v0, %v1217_v63  ;;  %v5028_v60 = vld [vmem:[#allocation18 + $0xe8] ss:$16 sps:$4 sm:$0xff]   ;;  %v5031_v63 = vld [vmem:[#allocation18 + $0x100] ss:$16 sps:$4 sm:$0xff]  }
 0x461   : > { %v1232_v6 = vpack.c.bf16 %v1220_v4, %v1218_v3  ;;  %v1194_v7 = vpop.f32.mrb[16].mxu0  ;;  %2769 = vmatpush1.bf16.msra.mxu1 %v4989_v61  ;;  %2851 = vmatpush1.bf16.msra.mxu0 %v4992_v62  ;;  %v5033_v61 = vld [vmem:[#allocation18 + $0x104] ss:$16 sps:$4 sm:$0xff]   ;;  %v5036_v62 = vld [vmem:[#allocation18 + $0x10c] ss:$16 sps:$4 sm:$0xff]  }
 0x462   : > { %v1195_v59 = vadd.f32 %v1194_v7, %v6524_v32  ;;  %v1196_v10 = vpop.f32.mrb[17].mxu0  ;;  %2770 = vmatprep.subr.bf16.mxu1 %v4997_v1  ;;  %2852 = vmatprep.subr.bf16.mxu0 %v5000_v2  ;;  %v5034_v0 = vld [vmem:[#allocation18 + $0x108] ss:$16 sps:$4 sm:$0xff]   ;;  %v5039_v1 = vld [vmem:[#allocation18 + $0x124] ss:$16 sps:$4 sm:$0xff]  }
 0x463   : > { %v1197_v13 = vadd.f32 %v1196_v10, %v6527_v33  ;;  %v1198_v14 = vpop.f32.mrb[18].mxu0  ;;  %1685 = vmatprep.mubr.bf16.mxu1 %v1232_v6  ;;  %1758 = vmatprep.mubr.bf16.mxu0 %v1232_v6  ;;  %v5042_v2 = vld [vmem:[#allocation18 + $0x12c] ss:$16 sps:$4 sm:$0xff]   ;;  %v5037_v3 = vld [vmem:[#allocation18 + $0x120] ss:$16 sps:$4 sm:$0xff]  }
 0x464   : > { %v1199_v15 = vadd.f32 %v1198_v14, %v6524_v32  ;;  %v1200_v16 = vpop.f32.mrb[19].mxu0  ;;  %1686 = vmatmul.mubr.bf16.gmra.mrb[12].mxu1 %v1231_v5  ;;  %1759 = vmatmul.mubr.bf16.gmra.mrb[28].mxu0 %v1231_v5  ;;  %v1221_v20 = vmax.f32 %v1195_v59, 0.0  ;;  %v5040_v4 = vld [vmem:[#allocation18 + $0x128] ss:$16 sps:$4 sm:$0xff]   ;;  %v5045_v5 = vld [vmem:[#allocation18 + $0x144] ss:$16 sps:$4 sm:$0xff]  }
 0x465   : > { %v1201_v17 = vadd.f32 %v1200_v16, %v6527_v33  ;;  %2771 = vmatpush1.bf16.msra.mxu1 %v4995_v8  ;;  %2853 = vmatpush1.bf16.msra.mxu0 %v4998_v9  ;;  %v1222_v24 = vmax.f32 %v1197_v13, 0.0  ;;  %v5048_v6 = vld [vmem:[#allocation18 + $0x14c] ss:$16 sps:$4 sm:$0xff]   ;;  %v5043_v7 = vld [vmem:[#allocation18 + $0x140] ss:$16 sps:$4 sm:$0xff]  }
 0x466   : > { %v1223_v21 = vmax.f32 %v1199_v15, 0.0  ;;  %2772 = vmatprep.subr.bf16.mxu1 %v5003_v11  ;;  %2854 = vmatprep.subr.bf16.mxu0 %v5006_v12  ;;  %v5046_v8 = vld [vmem:[#allocation18 + $0x148] ss:$16 sps:$4 sm:$0xff]   ;;  %v5051_v9 = vld [vmem:[#allocation18 + $0x164] ss:$16 sps:$4 sm:$0xff]  }
 0x467   : > { %v1224_v25 = vmax.f32 %v1201_v17, 0.0  ;;  %v5054_v59 = vld [vmem:[#allocation18 + $0x16c] ss:$16 sps:$4 sm:$0xff]   ;;  %v5049_v10 = vld [vmem:[#allocation18 + $0x160] ss:$16 sps:$4 sm:$0xff]  }
 0x468   : > { %v1233_v26 = vpack.c.bf16 %v1223_v21, %v1221_v20  ;;  %v5052_v11 = vld [vmem:[#allocation18 + $0x168] ss:$16 sps:$4 sm:$0xff]   ;;  %v5057_v12 = vld [vmem:[#allocation18 + $0x184] ss:$16 sps:$4 sm:$0xff]   ;;  %v5060_v13 = vld [vmem:[#allocation18 + $0x18c] ss:$16 sps:$4 sm:$0xff]  }
 0x469   : > { %v1234_v30 = vpack.c.bf16 %v1224_v25, %v1222_v24  ;;  %v1204_v34 = vpop.f32.mrb[20].mxu0  ;;  %2773 = vmatpush1.bf16.msra.mxu1 %v5001_v18  ;;  %2855 = vmatpush1.bf16.msra.mxu0 %v5004_v19  ;;  %v5055_v14 = vld [vmem:[#allocation18 + $0x180] ss:$16 sps:$4 sm:$0xff]   ;;  %v5058_v15 = vld [vmem:[#allocation18 + $0x188] ss:$16 sps:$4 sm:$0xff]  }
 0x46a   : > { %v1205_v37 = vadd.f32 %v1204_v34, %v6524_v32  ;;  %v1206_v38 = vpop.f32.mrb[21].mxu0  ;;  %2774 = vmatprep.subr.bf16.mxu1 %v5009_v22  ;;  %2856 = vmatprep.subr.bf16.mxu0 %v5012_v23  ;;  %v5063_v16 = vld [vmem:[#allocation18 + $0x1a4] ss:$16 sps:$4 sm:$0xff]   ;;  %v5066_v17 = vld [vmem:[#allocation18 + $0x1ac] ss:$16 sps:$4 sm:$0xff]  }
 0x46b   : > { %v1207_v39 = vadd.f32 %v1206_v38, %v6527_v33  ;;  %v1208_v40 = vpop.f32.mrb[22].mxu0  ;;  %1695 = vmatprep.mubr.bf16.mxu1 %v1234_v30  ;;  %1768 = vmatprep.mubr.bf16.mxu0 %v1234_v30  ;;  %v5061_v18 = vld [vmem:[#allocation18 + $0x1a0] ss:$16 sps:$4 sm:$0xff]   ;;  %v5064_v19 = vld [vmem:[#allocation18 + $0x1a8] ss:$16 sps:$4 sm:$0xff]   ;;  %v6549_v38 = vsub.s32 3, %v6515_v28 }
 0x46c   : > { %v1209_v41 = vadd.f32 %v1208_v40, %v6524_v32  ;;  %v1210_v42 = vpop.f32.mrb[23].mxu0  ;;  %1696 = vmatmul.mubr.bf16.gmra.mrb[16].mxu1 %v1233_v26  ;;  %1769 = vmatmul.mubr.bf16.gmra.mrb[32].mxu0 %v1233_v26  ;;  %v1225_v44 = vmax.f32 %v1205_v37, 0.0  ;;  %v5013_v32 = vld [vmem:[#allocation18 + $0xa0] ss:$16 sps:$4 sm:$0xff]   ;;  %v5069_v20 = vld [vmem:[#allocation18 + $0x1c4] ss:$16 sps:$4 sm:$0xff]  }
 0x46d   : > { %v1211_v43 = vadd.f32 %v1210_v42, %v6527_v33  ;;  %2775 = vmatpush1.bf16.msra.mxu1 %v5007_v35  ;;  %2857 = vmatpush1.bf16.msra.mxu0 %v5010_v36  ;;  %v1226_v46 = vmax.f32 %v1207_v39, 0.0  ;;  %v5021_v33 = vld [vmem:[#allocation18 + $0xc4] ss:$16 sps:$4 sm:$0xff]   ;;  %v5072_v21 = vld [vmem:[#allocation18 + $0x1cc] ss:$16 sps:$4 sm:$0xff]   ;;  %v6546_v36 = vsub.s32 2, %v6515_v28 }
 0x46e   : > { %v1227_v45 = vmax.f32 %v1209_v41, 0.0  ;;  %2776 = vmatprep.subr.bf16.mxu1 %v5015_v50  ;;  %2858 = vmatprep.subr.bf16.mxu0 %v5018_v51  ;;  %v5067_v22 = vld [vmem:[#allocation18 + $0x1c0] ss:$16 sps:$4 sm:$0xff]   ;;  %v5070_v23 = vld [vmem:[#allocation18 + $0x1c8] ss:$16 sps:$4 sm:$0xff]  }
 0x46f   : > { %v1228_v47 = vmax.f32 %v1211_v43, 0.0  ;;  %v5075_v24 = vld [vmem:[#allocation18 + $0x1e4] ss:$16 sps:$4 sm:$0xff]   ;;  %v5078_v25 = vld [vmem:[#allocation18 + $0x1ec] ss:$16 sps:$4 sm:$0xff]  }
 0x470   : > { %v1235_v48 = vpack.c.bf16 %v1227_v45, %v1225_v44  ;;  %v5073_v26 = vld [vmem:[#allocation18 + $0x1e0] ss:$16 sps:$4 sm:$0xff]   ;;  %v5076_v30 = vld [vmem:[#allocation18 + $0x1e8] ss:$16 sps:$4 sm:$0xff]   ;;  %v5081_v34 = vld [vmem:[#allocation18 + $0x204] ss:$16 sps:$4 sm:$0xff]  }
 0x471   : > { %v1236_v49 = vpack.c.bf16 %v1228_v47, %v1226_v46  ;;  %2777 = vmatpush1.bf16.msra.mxu1 %v5013_v32  ;;  %2859 = vmatpush1.bf16.msra.mxu0 %v5016_v52  ;;  %v5084_v35 = vld [vmem:[#allocation18 + $0x20c] ss:$16 sps:$4 sm:$0xff]  }
 0x472   : > { %2778 = vmatprep.subr.bf16.mxu1 %v5021_v33  ;;  %2860 = vmatprep.subr.bf16.mxu0 %v5024_v53  ;;  %v1301_v37 = vld [vmem:[#allocation17] sm:$0xf] }
 0x473   : > { %1705 = vmatprep.mubr.bf16.mxu1 %v1236_v49  ;;  %1778 = vmatprep.mubr.bf16.mxu0 %v1236_v49  ;;  %v6552_v39 = vrot.slane %v1301_v37, %v6518_v29  ;;  %v6555_v40 = vrot.slane %v1301_v37, %v6546_v36  ;;  %v6558_v43 = vrot.slane %v1301_v37, %v6521_v31 }
 0x474   : > { %1706 = vmatmul.mubr.bf16.gmra.mrb[20].mxu1 %v1235_v48  ;;  %1779 = vmatmul.mubr.bf16.gmra.mrb[36].mxu0 %v1235_v48  ;;  %v6561_v44 = vrot.slane %v1301_v37, %v6549_v38 }
 0x475   : > { %2779 = vmatpush1.bf16.msra.mxu1 %v5019_v54  ;;  %2861 = vmatpush1.bf16.msra.mxu0 %v5022_v55 }
 0x476   : > { %2780 = vmatprep.subr.bf16.mxu1 %v5027_v56  ;;  %2862 = vmatprep.subr.bf16.mxu0 %v5030_v57 }
 0x479   : > { %2781 = vmatpush1.bf16.msra.mxu1 %v5025_v58  ;;  %2863 = vmatpush1.bf16.msra.mxu0 %v5028_v60 }
 0x47a   : > { %2782 = vmatprep.subr.bf16.mxu1 %v5033_v61  ;;  %2864 = vmatprep.subr.bf16.mxu0 %v5036_v62 }
 0x47d   : > { %2783 = vmatpush1.bf16.msra.mxu1 %v5031_v63  ;;  %2865 = vmatpush1.bf16.msra.mxu0 %v5034_v0 }
 0x47e   : > { %2784 = vmatprep.subr.bf16.mxu1 %v5039_v1  ;;  %2866 = vmatprep.subr.bf16.mxu0 %v5042_v2 }
 0x481   : > { %2785 = vmatpush1.bf16.msra.mxu1 %v5037_v3  ;;  %2867 = vmatpush1.bf16.msra.mxu0 %v5040_v4 }
 0x482   : > { %2786 = vmatprep.subr.bf16.mxu1 %v5045_v5  ;;  %2868 = vmatprep.subr.bf16.mxu0 %v5048_v6 }
 0x485   : > { %2787 = vmatpush1.bf16.msra.mxu1 %v5043_v7  ;;  %2869 = vmatpush1.bf16.msra.mxu0 %v5046_v8 }
 0x486   : > { %2788 = vmatprep.subr.bf16.mxu1 %v5051_v9  ;;  %2870 = vmatprep.subr.bf16.mxu0 %v5054_v59 }
 0x489   : > { %2789 = vmatpush1.bf16.msra.mxu1 %v5049_v10  ;;  %2871 = vmatpush1.bf16.msra.mxu0 %v5052_v11 }
 0x48a   : > { %2790 = vmatprep.subr.bf16.mxu1 %v5057_v12  ;;  %2872 = vmatprep.subr.bf16.mxu0 %v5060_v13 }
 0x48d   : > { %2791 = vmatpush1.bf16.msra.mxu1 %v5055_v14  ;;  %2873 = vmatpush1.bf16.msra.mxu0 %v5058_v15 }
 0x48e   : > { %2792 = vmatprep.subr.bf16.mxu1 %v5063_v16  ;;  %2874 = vmatprep.subr.bf16.mxu0 %v5066_v17 }
 0x491   : > { %2793 = vmatpush1.bf16.msra.mxu1 %v5061_v18  ;;  %2875 = vmatpush1.bf16.msra.mxu0 %v5064_v19 }
 0x492   : > { %2794 = vmatprep.subr.bf16.mxu1 %v5069_v20  ;;  %2876 = vmatprep.subr.bf16.mxu0 %v5072_v21 }
 0x495   : > { %2795 = vmatpush1.bf16.msra.mxu1 %v5067_v22  ;;  %2877 = vmatpush1.bf16.msra.mxu0 %v5070_v23 }
 0x496   : > { %2796 = vmatprep.subr.bf16.mxu1 %v5075_v24  ;;  %2878 = vmatprep.subr.bf16.mxu0 %v5078_v25 }
 0x499   : > { %2797 = vmatpush1.bf16.msra.mxu1 %v5073_v26  ;;  %2879 = vmatpush1.bf16.msra.mxu0 %v5076_v30 }
 0x49a   : > { %2807 = vmatprep.subr.bf16.mxu1 %v5081_v34  ;;  %2889 = vmatprep.subr.bf16.mxu0 %v5084_v35 }
 0x52f   : > { %v1677_v41 = vpop.f32.mrb[8].mxu1  ;;  %v1750_v42 = vpop.f32.mrb[24].mxu0 }
 0x530   : > { %v1679_v45 = vpop.f32.mrb[9].mxu1  ;;  %v1752_v46 = vpop.f32.mrb[25].mxu0  ;;  %v1678_v49 = vadd.f32 %v1677_v41, %v6552_v39  ;;  %v1751_v50 = vadd.f32 %v1750_v42, %v6555_v40 }
 0x531   : > { %v1681_v47 = vpop.f32.mrb[10].mxu1  ;;  %v1754_v48 = vpop.f32.mrb[26].mxu0  ;;  %v1680_v53 = vadd.f32 %v1679_v45, %v6558_v43  ;;  %v1753_v54 = vadd.f32 %v1752_v46, %v6561_v44 }
 0x532   : > { %v1682_v51 = vadd.f32 %v1681_v47, %v6552_v39  ;;  %v1755_v32 = vadd.f32 %v1754_v48, %v6555_v40  ;;  %v1683_v52 = vpop.f32.mrb[11].mxu1  ;;  %v1756_v33 = vpop.f32.mrb[27].mxu0 }
 0x533   : > { %v1684_v55 = vadd.f32 %v1683_v52, %v6558_v43  ;;  %v1757_v56 = vadd.f32 %v1756_v33, %v6561_v44 }
 0x534   : > { %v1920_v57 = vmax.f32 %v1678_v49, %v1682_v51  ;;  %v1946_v58 = vmax.f32 %v1751_v50, %v1755_v32 }
 0x535   : > { %v1933_v60 = vmax.f32 %v1680_v53, %v1684_v55  ;;  %v1959_v61 = vmax.f32 %v1753_v54, %v1757_v56 }
 0x537   : > { %v1687_v62 = vpop.f32.mrb[12].mxu1  ;;  %v1760_v63 = vpop.f32.mrb[28].mxu0 }
 0x538   : > { %v1688_v0 = vadd.f32 %v1687_v62, %v6552_v39  ;;  %v1761_v1 = vadd.f32 %v1760_v63, %v6555_v40  ;;  %v1689_v2 = vpop.f32.mrb[13].mxu1  ;;  %v1762_v3 = vpop.f32.mrb[29].mxu0 }
 0x539   : > { %v1690_v4 = vadd.f32 %v1689_v2, %v6558_v43  ;;  %v1763_v5 = vadd.f32 %v1762_v3, %v6561_v44  ;;  %v1691_v6 = vpop.f32.mrb[14].mxu1  ;;  %v1764_v7 = vpop.f32.mrb[30].mxu0 }
 0x53a   : > { %v1921_v8 = vmax.f32 %v1920_v57, %v1688_v0  ;;  %v1947_v9 = vmax.f32 %v1946_v58, %v1761_v1  ;;  %v1692_v59 = vadd.f32 %v1691_v6, %v6552_v39  ;;  %v1765_v10 = vadd.f32 %v1764_v7, %v6555_v40  ;;  %v1693_v11 = vpop.f32.mrb[15].mxu1  ;;  %v1766_v12 = vpop.f32.mrb[31].mxu0 }
 0x53b   : > { %v1934_v13 = vmax.f32 %v1933_v60, %v1690_v4  ;;  %v1960_v14 = vmax.f32 %v1959_v61, %v1763_v5  ;;  %v1694_v15 = vadd.f32 %v1693_v11, %v6558_v43  ;;  %v1767_v16 = vadd.f32 %v1766_v12, %v6561_v44 }
 0x53c   : > { %v1922_v17 = vmax.f32 %v1921_v8, %v1692_v59  ;;  %v1948_v18 = vmax.f32 %v1947_v9, %v1765_v10 }
 0x53d   : > { %v1935_v19 = vmax.f32 %v1934_v13, %v1694_v15  ;;  %v1961_v20 = vmax.f32 %v1960_v14, %v1767_v16 }
 0x53f   : > { %v1697_v21 = vpop.f32.mrb[16].mxu1  ;;  %v1770_v22 = vpop.f32.mrb[32].mxu0 }
 0x540   : > { %v1698_v23 = vadd.f32 %v1697_v21, %v6552_v39  ;;  %v1771_v24 = vadd.f32 %v1770_v22, %v6555_v40  ;;  %v1699_v25 = vpop.f32.mrb[17].mxu1  ;;  %v1772_v26 = vpop.f32.mrb[33].mxu0 }
 0x541   : > { %v1700_v30 = vadd.f32 %v1699_v25, %v6558_v43  ;;  %v1773_v34 = vadd.f32 %v1772_v26, %v6561_v44  ;;  %v1701_v35 = vpop.f32.mrb[18].mxu1  ;;  %v1774_v37 = vpop.f32.mrb[34].mxu0 }
 0x542   : > { %v1923_v41 = vmax.f32 %v1922_v17, %v1698_v23  ;;  %v1949_v42 = vmax.f32 %v1948_v18, %v1771_v24  ;;  %v1702_v45 = vadd.f32 %v1701_v35, %v6552_v39  ;;  %v1775_v46 = vadd.f32 %v1774_v37, %v6555_v40  ;;  %v1703_v47 = vpop.f32.mrb[19].mxu1  ;;  %v1776_v48 = vpop.f32.mrb[35].mxu0  ;;  %v5079_v37 = vld [vmem:[#allocation18 + $0x200] ss:$16 sps:$4 sm:$0xff]  }
 0x543   : > { %v1936_v49 = vmax.f32 %v1935_v19, %v1700_v30  ;;  %v1962_v50 = vmax.f32 %v1961_v20, %v1773_v34  ;;  %v1704_v51 = vadd.f32 %v1703_v47, %v6558_v43  ;;  %v1777_v32 = vadd.f32 %v1776_v48, %v6561_v44  ;;  %v5085_v48 = vld [vmem:[#allocation18 + $0x220] ss:$16 sps:$4 sm:$0xff]  }
 0x544   : > { %v1924_v52 = vmax.f32 %v1923_v41, %v1702_v45  ;;  %v1950_v33 = vmax.f32 %v1949_v42, %v1775_v46  ;;  %v5082_v41 = vld [vmem:[#allocation18 + $0x208] ss:$16 sps:$4 sm:$0xff]   ;;  %v5087_v45 = vld [vmem:[#allocation18 + $0x224] ss:$16 sps:$4 sm:$0xff]   ;;  %v5090_v46 = vld [vmem:[#allocation18 + $0x22c] ss:$16 sps:$4 sm:$0xff]  }
 0x545   : > { %v1937_v53 = vmax.f32 %v1936_v49, %v1704_v51  ;;  %v1963_v54 = vmax.f32 %v1962_v50, %v1777_v32  ;;  %v5088_v49 = vld [vmem:[#allocation18 + $0x228] ss:$16 sps:$4 sm:$0xff]   ;;  %v5093_v50 = vld [vmem:[#allocation18 + $0x244] ss:$16 sps:$4 sm:$0xff]   ;;  %v5096_v51 = vld [vmem:[#allocation18 + $0x24c] ss:$16 sps:$4 sm:$0xff]  }
 0x546   : > { %v5091_v32 = vld [vmem:[#allocation18 + $0x240] ss:$16 sps:$4 sm:$0xff]  }
 0x547   : > { %v1707_v55 = vpop.f32.mrb[20].mxu1  ;;  %v1780_v56 = vpop.f32.mrb[36].mxu0 }
 0x548   : > { %v1708_v57 = vadd.f32 %v1707_v55, %v6552_v39  ;;  %v1781_v58 = vadd.f32 %v1780_v56, %v6555_v40  ;;  %v1709_v60 = vpop.f32.mrb[21].mxu1  ;;  %v1782_v61 = vpop.f32.mrb[37].mxu0  ;;  %v5100_v55 = vld [vmem:[#allocation18 + $0x268] ss:$16 sps:$4 sm:$0xff]   ;;  %v5105_v56 = vld [vmem:[#allocation18 + $0x284] ss:$16 sps:$4 sm:$0xff]  }
 0x549   : > { %v1710_v62 = vadd.f32 %v1709_v60, %v6558_v43  ;;  %v1783_v63 = vadd.f32 %v1782_v61, %v6561_v44  ;;  %v1711_v0 = vpop.f32.mrb[22].mxu1  ;;  %v1784_v1 = vpop.f32.mrb[38].mxu0  ;;  %v5106_v60 = vld [vmem:[#allocation18 + $0x288] ss:$16 sps:$4 sm:$0xff]   ;;  %v5111_v61 = vld [vmem:[#allocation18 + $0x2a4] ss:$16 sps:$4 sm:$0xff]  }
 0x54a   : > { %v1925_v2 = vmax.f32 %v1924_v52, %v1708_v57  ;;  %v1951_v3 = vmax.f32 %v1950_v33, %v1781_v58  ;;  %v1712_v4 = vadd.f32 %v1711_v0, %v6552_v39  ;;  %v1785_v5 = vadd.f32 %v1784_v1, %v6555_v40  ;;  %v1713_v6 = vpop.f32.mrb[23].mxu1  ;;  %v1786_v7 = vpop.f32.mrb[39].mxu0  ;;  %v5094_v52 = vld [vmem:[#allocation18 + $0x248] ss:$16 sps:$4 sm:$0xff]   ;;  %v5099_v33 = vld [vmem:[#allocation18 + $0x264] ss:$16 sps:$4 sm:$0xff]  }
 0x54b   : > { %v1938_v8 = vmax.f32 %v1937_v53, %v1710_v62  ;;  %v1964_v9 = vmax.f32 %v1963_v54, %v1783_v63  ;;  %v1714_v59 = vadd.f32 %v1713_v6, %v6558_v43  ;;  %v1787_v10 = vadd.f32 %v1786_v7, %v6561_v44  ;;  %v5102_v53 = vld [vmem:[#allocation18 + $0x26c] ss:$16 sps:$4 sm:$0xff]   ;;  %v5097_v54 = vld [vmem:[#allocation18 + $0x260] ss:$16 sps:$4 sm:$0xff]   ;;  %v5112_v0 = vld [vmem:[#allocation18 + $0x2a8] ss:$16 sps:$4 sm:$0xff]  }
 0x54c   : > { %v1926_v11 = vmax.f32 %v1925_v2, %v1712_v4  ;;  %v6595_v12 = vmax.f32 %v1951_v3, %v1785_v5  ;;  %v5108_v57 = vld [vmem:[#allocation18 + $0x28c] ss:$16 sps:$4 sm:$0xff]   ;;  %v5103_v58 = vld [vmem:[#allocation18 + $0x280] ss:$16 sps:$4 sm:$0xff]   ;;  %v5117_v1 = vld [vmem:[#allocation18 + $0x2c4] ss:$16 sps:$4 sm:$0xff]  }
 0x54d   : > { %v1939_v13 = vmax.f32 %v1938_v8, %v1714_v59  ;;  %v1965_v14 = vmax.f32 %v1964_v9, %v1787_v10  ;;  %v5114_v62 = vld [vmem:[#allocation18 + $0x2ac] ss:$16 sps:$4 sm:$0xff]   ;;  %v5109_v63 = vld [vmem:[#allocation18 + $0x2a0] ss:$16 sps:$4 sm:$0xff]   ;;  %v5118_v4 = vld [vmem:[#allocation18 + $0x2c8] ss:$16 sps:$4 sm:$0xff]  }
 0x54e   : > { %v1927_v15 = vrot.slane %v1926_v11, 4  ;;  %v5120_v2 = vld [vmem:[#allocation18 + $0x2cc] ss:$16 sps:$4 sm:$0xff]   ;;  %v5115_v3 = vld [vmem:[#allocation18 + $0x2c0] ss:$16 sps:$4 sm:$0xff]  }
 0x54f   : > { %v1940_v16 = vrot.slane %v1939_v13, 4  ;;  %v1966_v17 = vrot.slane %v1965_v14, 4  ;;  %v5123_v5 = vld [vmem:[#allocation18 + $0x2e4] ss:$16 sps:$4 sm:$0xff]   ;;  %v5126_v6 = vld [vmem:[#allocation18 + $0x2ec] ss:$16 sps:$4 sm:$0xff]  }
 0x550   : > { %v1928_v18 = vmax.f32 %v1926_v11, %v1927_v15  ;;  %v5121_v7 = vld [vmem:[#allocation18 + $0x2e0] ss:$16 sps:$4 sm:$0xff]   ;;  %v5124_v8 = vld [vmem:[#allocation18 + $0x2e8] ss:$16 sps:$4 sm:$0xff]   ;;  %v5129_v9 = vld [vmem:[#allocation18 + $0x304] ss:$16 sps:$4 sm:$0xff]  }
 0x551   : > { %v1941_v39 = vmax.f32 %v1939_v13, %v1940_v16  ;;  %v1967_v19 = vmax.f32 %v1965_v14, %v1966_v17  ;;  %v5132_v59 = vld [vmem:[#allocation18 + $0x30c] ss:$16 sps:$4 sm:$0xff]   ;;  %v5127_v10 = vld [vmem:[#allocation18 + $0x300] ss:$16 sps:$4 sm:$0xff]   ;;  %v5130_v11 = vld [vmem:[#allocation18 + $0x308] ss:$16 sps:$4 sm:$0xff]  }
 0x552   : > { %v1929_v40 = vrot.slane %v1928_v18, 2  ;;  %v5135_v13 = vld [vmem:[#allocation18 + $0x324] ss:$16 sps:$4 sm:$0xff]   ;;  %v5138_v14 = vld [vmem:[#allocation18 + $0x32c] ss:$16 sps:$4 sm:$0xff]  }
 0x553   : > { %v1942_v20 = vrot.slane %v1941_v39, 2  ;;  %v1968_v21 = vrot.slane %v1967_v19, 2  ;;  %v5133_v15 = vld [vmem:[#allocation18 + $0x320] ss:$16 sps:$4 sm:$0xff]   ;;  %v5136_v16 = vld [vmem:[#allocation18 + $0x328] ss:$16 sps:$4 sm:$0xff]  }
 0x554   : > { %v1930_v22 = vmax.f32 %v1928_v18, %v1929_v40  ;;  %v5141_v17 = vld [vmem:[#allocation18 + $0x344] ss:$16 sps:$4 sm:$0xff]   ;;  %v5144_v18 = vld [vmem:[#allocation18 + $0x34c] ss:$16 sps:$4 sm:$0xff]   ;;  %v1953_v40 = vrot.slane %v6595_v12, 4 }
 0x555   : > { %v1943_v23 = vmax.f32 %v1941_v39, %v1942_v20  ;;  %v1969_v24 = vmax.f32 %v1967_v19, %v1968_v21  ;;  %v5139_v39 = vld [vmem:[#allocation18 + $0x340] ss:$16 sps:$4 sm:$0xff]   ;;  %v5142_v19 = vld [vmem:[#allocation18 + $0x348] ss:$16 sps:$4 sm:$0xff]   ;;  %v5147_v20 = vld [vmem:[#allocation18 + $0x364] ss:$16 sps:$4 sm:$0xff]  }
 0x556   : > { %v1931_v43 = vrot.slane %v1930_v22, 1  ;;  %v5150_v21 = vld [vmem:[#allocation18 + $0x36c] ss:$16 sps:$4 sm:$0xff]  }
 0x557   : > { %v1944_v25 = vrot.slane %v1943_v23, 1  ;;  %v1970_v44 = vrot.slane %v1969_v24, 1 }
 0x558   : > { %v1932_v26 = vmax.f32 %v1930_v22, %v1931_v43  ;;  %v5145_v22 = vld [vmem:[#allocation18 + $0x360] ss:$16 sps:$4 sm:$0xff]   ;;  %v5153_v43 = vld [vmem:[#allocation18 + $0x384] ss:$16 sps:$4 sm:$0xff]  }
 0x559   : > { %v1945_v30 = vmax.f32 %v1943_v23, %v1944_v25  ;;  %v1971_v34 = vmax.f32 %v1969_v24, %v1970_v44  ;;  %v5148_v23 = vld [vmem:[#allocation18 + $0x368] ss:$16 sps:$4 sm:$0xff]   ;;  %v1954_v24 = vmax.f32 %v6595_v12, %v1953_v40  ;;  %v5156_v25 = vld [vmem:[#allocation18 + $0x38c] ss:$16 sps:$4 sm:$0xff]   ;;  %v5151_v44 = vld [vmem:[#allocation18 + $0x380] ss:$16 sps:$4 sm:$0xff]  }
 0x55a   : > { %v1972_v42 = vpack.c.bf16 %v1932_v26, %v1932_v26  ;;  %v5154_v26 = vld [vmem:[#allocation18 + $0x388] ss:$16 sps:$4 sm:$0xff]   ;;  %v5165_v12 = vld [vmem:[#allocation18 + $0x3c4] ss:$16 sps:$4 sm:$0xff]  }
 0x55b   : > { %v1973_v35 = vpack.c.bf16 %v1945_v30, %v1945_v30  ;;  %v1975_v47 = vpack.c.bf16 %v1971_v34, %v1971_v34  ;;  %v1955_v30 = vrot.slane %v1954_v24, 2  ;;  %v5159_v34 = vld [vmem:[#allocation18 + $0x3a4] ss:$16 sps:$4 sm:$0xff]  }
 0x55c   : > { %v5220_v40 = vld [vmem:[#allocation21 + $0xf0] ss:$8 sps:$4 sm:$0xff]  }
 0x55d   : > { %2798 = vmatprep.mubr.bf16.mxu1 %v1973_v35  ;;  %2880 = vmatprep.mubr.bf16.mxu0 %v1973_v35  ;;  %v5162_v35 = vld [vmem:[#allocation18 + $0x3ac] ss:$16 sps:$4 sm:$0xff]  }
 0x55e   : > { %2799 = vmatmul.mubr.bf16.vlgmr.msra.gmra.mrb[24].mxu1 %v1972_v42  ;;  %2881 = vmatmul.mubr.bf16.vlgmr.msra.gmra.mrb[40].mxu0 %v1972_v42  ;;  %v1956_v42 = vmax.f32 %v1954_v24, %v1955_v30  ;;  %v5274_v24 = vld [vmem:[#allocation24 + $0x20] ss:$16 sps:$4 sm:$0xff]   ;;  %v5285_v30 = vld [vmem:[#allocation24 + $0x84] ss:$16 sps:$4 sm:$0xff]  }
 0x55f   : > { %2808 = vmatpush1.bf16.msra.mxu1 %v5079_v37  ;;  %2890 = vmatpush1.bf16.msra.mxu0 %v5082_v41  ;;  %v5157_v37 = vld [vmem:[#allocation18 + $0x3a0] ss:$16 sps:$4 sm:$0xff]   ;;  %v5160_v41 = vld [vmem:[#allocation18 + $0x3a8] ss:$16 sps:$4 sm:$0xff]  }
 0x560   : > { %2839 = vmatprep.mubr.bf16.mxu1 %v1975_v47  ;;  %2921 = vmatprep.mubr.bf16.mxu0 %v1975_v47  ;;  %v5166_v47 = vld [vmem:[#allocation18 + $0x3c8] ss:$16 sps:$4 sm:$0xff]  }
 0x561   : > { %2809 = vmatprep.subr.bf16.mxu1 %v5087_v45  ;;  %2891 = vmatprep.subr.bf16.mxu0 %v5090_v46  ;;  %v5168_v45 = vld [vmem:[#allocation18 + $0x3cc] ss:$16 sps:$4 sm:$0xff]   ;;  %v5163_v46 = vld [vmem:[#allocation18 + $0x3c0] ss:$16 sps:$4 sm:$0xff]  }
 0x563   : > { %2810 = vmatpush1.bf16.msra.mxu1 %v5085_v48  ;;  %2892 = vmatpush1.bf16.msra.mxu0 %v5088_v49  ;;  %v1957_v48 = vrot.slane %v1956_v42, 1  ;;  %v5171_v49 = vld [vmem:[#allocation18 + $0x3e4] ss:$16 sps:$4 sm:$0xff]  }
 0x564   : > { %2811 = vmatprep.subr.bf16.mxu1 %v5093_v50  ;;  %2893 = vmatprep.subr.bf16.mxu0 %v5096_v51  ;;  %v5174_v50 = vld [vmem:[#allocation18 + $0x3ec] ss:$16 sps:$4 sm:$0xff]   ;;  %v5169_v51 = vld [vmem:[#allocation18 + $0x3e0] ss:$16 sps:$4 sm:$0xff]  }
 0x567   : > { %2812 = vmatpush1.bf16.msra.mxu1 %v5091_v32  ;;  %2894 = vmatpush1.bf16.msra.mxu0 %v5094_v52  ;;  %v5172_v32 = vld [vmem:[#allocation18 + $0x3e8] ss:$16 sps:$4 sm:$0xff]   ;;  %v1958_v52 = vmax.f32 %v1956_v42, %v1957_v48 }
 0x568   : > { %2813 = vmatprep.subr.bf16.mxu1 %v5099_v33  ;;  %2895 = vmatprep.subr.bf16.mxu0 %v5102_v53  ;;  %v5177_v33 = vld [vmem:[#allocation21 + $0x4] ss:$8 sps:$4 sm:$0xff]   ;;  %v5175_v53 = vld [vmem:[#allocation21] ss:$8 sps:$4 sm:$0xff]  }
 0x569   : > { %v5289_v42 = vld [vmem:[#allocation24 + $0xc0] ss:$16 sps:$4 sm:$0xff]   ;;  %v5300_v48 = vld [vmem:[#allocation24 + $0x124] ss:$16 sps:$4 sm:$0xff]  }
 0x56b   : > { %2814 = vmatpush1.bf16.msra.mxu1 %v5097_v54  ;;  %2896 = vmatpush1.bf16.msra.mxu0 %v5100_v55  ;;  %v1974_v54 = vpack.c.bf16 %v1958_v52, %v1958_v52  ;;  %v5180_v55 = vld [vmem:[#allocation21 + $0x14] ss:$8 sps:$4 sm:$0xff]  }
 0x56c   : > { %2815 = vmatprep.subr.bf16.mxu1 %v5105_v56  ;;  %2897 = vmatprep.subr.bf16.mxu0 %v5108_v57  ;;  %v5178_v56 = vld [vmem:[#allocation21 + $0x10] ss:$8 sps:$4 sm:$0xff]   ;;  %v5183_v57 = vld [vmem:[#allocation21 + $0x24] ss:$8 sps:$4 sm:$0xff]  }
 0x56d   : > { %v5304_v52 = vld [vmem:[#allocation24 + $0x160] ss:$16 sps:$4 sm:$0xff]  }
 0x56f   : > { %2816 = vmatpush1.bf16.msra.mxu1 %v5103_v58  ;;  %2898 = vmatpush1.bf16.msra.mxu0 %v5106_v60  ;;  %v5181_v58 = vld [vmem:[#allocation21 + $0x20] ss:$8 sps:$4 sm:$0xff]   ;;  %v5186_v60 = vld [vmem:[#allocation21 + $0x34] ss:$8 sps:$4 sm:$0xff]  }
 0x570   : > { %2817 = vmatprep.subr.bf16.mxu1 %v5111_v61  ;;  %2899 = vmatprep.subr.bf16.mxu0 %v5114_v62  ;;  %v5184_v61 = vld [vmem:[#allocation21 + $0x30] ss:$8 sps:$4 sm:$0xff]   ;;  %v5189_v62 = vld [vmem:[#allocation21 + $0x44] ss:$8 sps:$4 sm:$0xff]  }
 0x573   : > { %2818 = vmatpush1.bf16.msra.mxu1 %v5109_v63  ;;  %2900 = vmatpush1.bf16.msra.mxu0 %v5112_v0  ;;  %v5187_v63 = vld [vmem:[#allocation21 + $0x40] ss:$8 sps:$4 sm:$0xff]   ;;  %v5192_v0 = vld [vmem:[#allocation21 + $0x54] ss:$8 sps:$4 sm:$0xff]  }
 0x574   : > { %2819 = vmatprep.subr.bf16.mxu1 %v5117_v1  ;;  %2901 = vmatprep.subr.bf16.mxu0 %v5120_v2  ;;  %v5190_v1 = vld [vmem:[#allocation21 + $0x50] ss:$8 sps:$4 sm:$0xff]   ;;  %v5195_v2 = vld [vmem:[#allocation21 + $0x64] ss:$8 sps:$4 sm:$0xff]  }
 0x577   : > { %2820 = vmatpush1.bf16.msra.mxu1 %v5115_v3  ;;  %2902 = vmatpush1.bf16.msra.mxu0 %v5118_v4  ;;  %v5193_v3 = vld [vmem:[#allocation21 + $0x60] ss:$8 sps:$4 sm:$0xff]   ;;  %v5198_v4 = vld [vmem:[#allocation21 + $0x74] ss:$8 sps:$4 sm:$0xff]  }
 0x578   : > { %2821 = vmatprep.subr.bf16.mxu1 %v5123_v5  ;;  %2903 = vmatprep.subr.bf16.mxu0 %v5126_v6  ;;  %v5196_v5 = vld [vmem:[#allocation21 + $0x70] ss:$8 sps:$4 sm:$0xff]   ;;  %v5201_v6 = vld [vmem:[#allocation21 + $0x84] ss:$8 sps:$4 sm:$0xff]  }
 0x57b   : > { %2822 = vmatpush1.bf16.msra.mxu1 %v5121_v7  ;;  %2904 = vmatpush1.bf16.msra.mxu0 %v5124_v8  ;;  %v5199_v7 = vld [vmem:[#allocation21 + $0x80] ss:$8 sps:$4 sm:$0xff]   ;;  %v5204_v8 = vld [vmem:[#allocation21 + $0x94] ss:$8 sps:$4 sm:$0xff]  }
 0x57c   : > { %2823 = vmatprep.subr.bf16.mxu1 %v5129_v9  ;;  %2905 = vmatprep.subr.bf16.mxu0 %v5132_v59  ;;  %v5202_v9 = vld [vmem:[#allocation21 + $0x90] ss:$8 sps:$4 sm:$0xff]   ;;  %v5207_v59 = vld [vmem:[#allocation21 + $0xa4] ss:$8 sps:$4 sm:$0xff]  }
 0x57f   : > { %2824 = vmatpush1.bf16.msra.mxu1 %v5127_v10  ;;  %2906 = vmatpush1.bf16.msra.mxu0 %v5130_v11  ;;  %v5205_v10 = vld [vmem:[#allocation21 + $0xa0] ss:$8 sps:$4 sm:$0xff]   ;;  %v5210_v11 = vld [vmem:[#allocation21 + $0xb4] ss:$8 sps:$4 sm:$0xff]  }
 0x580   : > { %2825 = vmatprep.subr.bf16.mxu1 %v5135_v13  ;;  %2907 = vmatprep.subr.bf16.mxu0 %v5138_v14  ;;  %v5208_v13 = vld [vmem:[#allocation21 + $0xb0] ss:$8 sps:$4 sm:$0xff]   ;;  %v5213_v14 = vld [vmem:[#allocation21 + $0xc4] ss:$8 sps:$4 sm:$0xff]  }
 0x583   : > { %2826 = vmatpush1.bf16.msra.mxu1 %v5133_v15  ;;  %2908 = vmatpush1.bf16.msra.mxu0 %v5136_v16  ;;  %v5211_v15 = vld [vmem:[#allocation21 + $0xc0] ss:$8 sps:$4 sm:$0xff]   ;;  %v5216_v16 = vld [vmem:[#allocation21 + $0xd4] ss:$8 sps:$4 sm:$0xff]  }
 0x584   : > { %2827 = vmatprep.subr.bf16.mxu1 %v5141_v17  ;;  %2909 = vmatprep.subr.bf16.mxu0 %v5144_v18  ;;  %v5214_v17 = vld [vmem:[#allocation21 + $0xd0] ss:$8 sps:$4 sm:$0xff]   ;;  %v5219_v18 = vld [vmem:[#allocation21 + $0xe4] ss:$8 sps:$4 sm:$0xff]  }
 0x587   : > { %2828 = vmatpush1.bf16.msra.mxu1 %v5139_v39  ;;  %2910 = vmatpush1.bf16.msra.mxu0 %v5142_v19  ;;  %v5217_v39 = vld [vmem:[#allocation21 + $0xe0] ss:$8 sps:$4 sm:$0xff]   ;;  %v5222_v19 = vld [vmem:[#allocation21 + $0xf4] ss:$8 sps:$4 sm:$0xff]  }
 0x588   : > { %2829 = vmatprep.subr.bf16.mxu1 %v5147_v20  ;;  %2911 = vmatprep.subr.bf16.mxu0 %v5150_v21  ;;  %v5225_v20 = vld [vmem:[#allocation21 + $0x104] ss:$8 sps:$4 sm:$0xff]  }
 0x589   : > { %v5271_v21 = vld [vmem:[#allocation24] ss:$16 sps:$4 sm:$0xff]  }
 0x58b   : > { %2830 = vmatpush1.bf16.msra.mxu1 %v5145_v22  ;;  %2912 = vmatpush1.bf16.msra.mxu0 %v5148_v23  ;;  %v5273_v22 = vld [vmem:[#allocation24 + $0x4] ss:$16 sps:$4 sm:$0xff]  }
 0x58c   : > { %2831 = vmatprep.subr.bf16.mxu1 %v5153_v43  ;;  %2913 = vmatprep.subr.bf16.mxu0 %v5156_v25  ;;  %v5276_v23 = vld [vmem:[#allocation24 + $0x24] ss:$16 sps:$4 sm:$0xff]   ;;  %v5277_v25 = vld [vmem:[#allocation24 + $0x40] ss:$16 sps:$4 sm:$0xff]  }
 0x58d   : > { %v5279_v43 = vld [vmem:[#allocation24 + $0x44] ss:$16 sps:$4 sm:$0xff]  }
 0x58f   : > { %2832 = vmatpush1.bf16.msra.mxu1 %v5151_v44  ;;  %2914 = vmatpush1.bf16.msra.mxu0 %v5154_v26  ;;  %v5282_v44 = vld [vmem:[#allocation24 + $0x64] ss:$16 sps:$4 sm:$0xff]   ;;  %v5280_v26 = vld [vmem:[#allocation24 + $0x60] ss:$16 sps:$4 sm:$0xff]  }
 0x590   : > { %2833 = vmatprep.subr.bf16.mxu1 %v5159_v34  ;;  %2915 = vmatprep.subr.bf16.mxu0 %v5162_v35  ;;  %v5283_v34 = vld [vmem:[#allocation24 + $0x80] ss:$16 sps:$4 sm:$0xff]   ;;  %v5288_v35 = vld [vmem:[#allocation24 + $0xa4] ss:$16 sps:$4 sm:$0xff]  }
 0x593   : > { %2834 = vmatpush1.bf16.msra.mxu1 %v5157_v37  ;;  %2916 = vmatpush1.bf16.msra.mxu0 %v5160_v41  ;;  %v5286_v37 = vld [vmem:[#allocation24 + $0xa0] ss:$16 sps:$4 sm:$0xff]   ;;  %v5291_v41 = vld [vmem:[#allocation24 + $0xc4] ss:$16 sps:$4 sm:$0xff]  }
 0x594   : > { %2835 = vmatprep.subr.bf16.mxu1 %v5165_v12  ;;  %2917 = vmatprep.subr.bf16.mxu0 %v5168_v45  ;;  %v5294_v12 = vld [vmem:[#allocation24 + $0xe4] ss:$16 sps:$4 sm:$0xff]   ;;  %v5292_v45 = vld [vmem:[#allocation24 + $0xe0] ss:$16 sps:$4 sm:$0xff]  }
 0x597   : > { %2836 = vmatpush1.bf16.msra.mxu1 %v5163_v46  ;;  %2918 = vmatpush1.bf16.msra.mxu0 %v5166_v47  ;;  %v5297_v46 = vld [vmem:[#allocation24 + $0x104] ss:$16 sps:$4 sm:$0xff]   ;;  %v5295_v47 = vld [vmem:[#allocation24 + $0x100] ss:$16 sps:$4 sm:$0xff]  }
 0x598   : > { %2837 = vmatprep.subr.bf16.mxu1 %v5171_v49  ;;  %2919 = vmatprep.subr.bf16.mxu0 %v5174_v50  ;;  %v5298_v49 = vld [vmem:[#allocation24 + $0x120] ss:$16 sps:$4 sm:$0xff]   ;;  %v5303_v50 = vld [vmem:[#allocation24 + $0x144] ss:$16 sps:$4 sm:$0xff]  }
 0x59b   : > { %2838 = vmatpush1.bf16.msra.mxu1 %v5169_v51  ;;  %2920 = vmatpush1.bf16.msra.mxu0 %v5172_v32  ;;  %v5301_v51 = vld [vmem:[#allocation24 + $0x140] ss:$16 sps:$4 sm:$0xff]   ;;  %v5306_v32 = vld [vmem:[#allocation24 + $0x164] ss:$16 sps:$4 sm:$0xff]  }
 0x59c   : > { %3334 = vmatprep.subr.bf16.mxu1 %v5177_v33  ;;  %3826 = vmatprep.subr.bf16.mxu0 %v5273_v22  ;;  %v5309_v33 = vld [vmem:[#allocation24 + $0x184] ss:$16 sps:$4 sm:$0xff]  }
 0x59d   : > { %v5238_v22 = vld [vmem:[#allocation21 + $0x150] ss:$8 sps:$4 sm:$0xff]  }
 0x59e   : > { %2840 = vmatmul.mubr.bf16.vlgmr.msra.gmra.mrb[24].mxu1 %v1974_v54  ;;  %2922 = vmatmul.mubr.bf16.vlgmr.msra.gmra.mrb[40].mxu0 %v1974_v54  ;;  %v5312_v54 = vld [vmem:[#allocation24 + $0x1a4] ss:$16 sps:$4 sm:$0xff]  }
 0x59f   : > { %3335 = vmatpush1.bf16.msra.mxu1 %v5175_v53  ;;  %3827 = vmatpush1.bf16.msra.mxu0 %v5271_v21  ;;  %v5307_v53 = vld [vmem:[#allocation24 + $0x180] ss:$16 sps:$4 sm:$0xff]  }
 0x5a0   : > { %3336 = vmatprep.subr.bf16.mxu1 %v5180_v55  ;;  %3828 = vmatprep.subr.bf16.mxu0 %v5276_v23  ;;  %v6599_v55 = vld [vmem:[#allocation20] sm:$0xf]  ;;  %v5243_v23 = vld [vmem:[#allocation21 + $0x164] ss:$8 sps:$4 sm:$0xff]  }
 0x5a1   : > { %v5240_v21 = vld [vmem:[#allocation21 + $0x154] ss:$8 sps:$4 sm:$0xff]  }
 0x5a3   : > { %3337 = vmatpush1.bf16.msra.mxu1 %v5178_v56  ;;  %3829 = vmatpush1.bf16.msra.mxu0 %v5274_v24  ;;  %v5310_v56 = vld [vmem:[#allocation24 + $0x1a0] ss:$16 sps:$4 sm:$0xff]  }
 0x5a4   : > { %3338 = vmatprep.subr.bf16.mxu1 %v5183_v57  ;;  %3830 = vmatprep.subr.bf16.mxu0 %v5279_v43  ;;  %v2749_v57 = vrot.slane %v6599_v55, %v6518_v29  ;;  %v5241_v24 = vld [vmem:[#allocation21 + $0x160] ss:$8 sps:$4 sm:$0xff]   ;;  %v5246_v43 = vld [vmem:[#allocation21 + $0x174] ss:$8 sps:$4 sm:$0xff]  }
 0x5a7   : > { %3339 = vmatpush1.bf16.msra.mxu1 %v5181_v58  ;;  %3831 = vmatpush1.bf16.msra.mxu0 %v5277_v25  ;;  %v2753_v58 = vrot.slane %v6599_v55, %v6521_v31  ;;  %v5244_v25 = vld [vmem:[#allocation21 + $0x170] ss:$8 sps:$4 sm:$0xff]  }
 0x5a8   : > { %3340 = vmatprep.subr.bf16.mxu1 %v5186_v60  ;;  %3832 = vmatprep.subr.bf16.mxu0 %v5282_v44  ;;  %v2761_v60 = vrot.slane %v6599_v55, %v6549_v38  ;;  %v5249_v44 = vld [vmem:[#allocation21 + $0x184] ss:$8 sps:$4 sm:$0xff]  }
 0x5ab   : > { %3341 = vmatpush1.bf16.msra.mxu1 %v5184_v61  ;;  %3833 = vmatpush1.bf16.msra.mxu0 %v5280_v26  ;;  %v5247_v26 = vld [vmem:[#allocation21 + $0x180] ss:$8 sps:$4 sm:$0xff]  }
 0x5ac   : > { %3342 = vmatprep.subr.bf16.mxu1 %v5189_v62  ;;  %3834 = vmatprep.subr.bf16.mxu0 %v5285_v30  ;;  %v5252_v30 = vld [vmem:[#allocation21 + $0x194] ss:$8 sps:$4 sm:$0xff]  }
 0x5af   : > { %3343 = vmatpush1.bf16.msra.mxu1 %v5187_v63  ;;  %3835 = vmatpush1.bf16.msra.mxu0 %v5283_v34  ;;  %v5250_v34 = vld [vmem:[#allocation21 + $0x190] ss:$8 sps:$4 sm:$0xff]  }
 0x5b0   : > { %3344 = vmatprep.subr.bf16.mxu1 %v5192_v0  ;;  %3836 = vmatprep.subr.bf16.mxu0 %v5288_v35  ;;  %v5255_v35 = vld [vmem:[#allocation21 + $0x1a4] ss:$8 sps:$4 sm:$0xff]  }
 0x5b3   : > { %3345 = vmatpush1.bf16.msra.mxu1 %v5190_v1  ;;  %3837 = vmatpush1.bf16.msra.mxu0 %v5286_v37  ;;  %v5253_v37 = vld [vmem:[#allocation21 + $0x1a0] ss:$8 sps:$4 sm:$0xff]  }
 0x5b4   : > { %3346 = vmatprep.subr.bf16.mxu1 %v5195_v2  ;;  %3838 = vmatprep.subr.bf16.mxu0 %v5291_v41  ;;  %v5258_v41 = vld [vmem:[#allocation21 + $0x1b4] ss:$8 sps:$4 sm:$0xff]  }
 0x5b7   : > { %3347 = vmatpush1.bf16.msra.mxu1 %v5193_v3  ;;  %3839 = vmatpush1.bf16.msra.mxu0 %v5289_v42  ;;  %v5256_v42 = vld [vmem:[#allocation21 + $0x1b0] ss:$8 sps:$4 sm:$0xff]  }
 0x5b8   : > { %3348 = vmatprep.subr.bf16.mxu1 %v5198_v4  ;;  %3840 = vmatprep.subr.bf16.mxu0 %v5294_v12  ;;  %v5261_v12 = vld [vmem:[#allocation21 + $0x1c4] ss:$8 sps:$4 sm:$0xff]  }
 0x5bb   : > { %3349 = vmatpush1.bf16.msra.mxu1 %v5196_v5  ;;  %3841 = vmatpush1.bf16.msra.mxu0 %v5292_v45  ;;  %v5259_v45 = vld [vmem:[#allocation21 + $0x1c0] ss:$8 sps:$4 sm:$0xff]  }
 0x5bc   : > { %3350 = vmatprep.subr.bf16.mxu1 %v5201_v6  ;;  %3842 = vmatprep.subr.bf16.mxu0 %v5297_v46  ;;  %v5264_v46 = vld [vmem:[#allocation21 + $0x1d4] ss:$8 sps:$4 sm:$0xff]  }
 0x5bf   : > { %3351 = vmatpush1.bf16.msra.mxu1 %v5199_v7  ;;  %3843 = vmatpush1.bf16.msra.mxu0 %v5295_v47  ;;  %v5262_v47 = vld [vmem:[#allocation21 + $0x1d0] ss:$8 sps:$4 sm:$0xff]  }
 0x5c0   : > { %3352 = vmatprep.subr.bf16.mxu1 %v5204_v8  ;;  %3844 = vmatprep.subr.bf16.mxu0 %v5300_v48  ;;  %v2757_v48 = vrot.slane %v6599_v55, %v6546_v36  ;;  %v5318_v55 = vld [vmem:[#allocation24 + $0x1e4] ss:$16 sps:$4 sm:$0xff]  }
 0x5c3   : > { %3353 = vmatpush1.bf16.msra.mxu1 %v5202_v9  ;;  %3845 = vmatpush1.bf16.msra.mxu0 %v5298_v49  ;;  %v5267_v49 = vld [vmem:[#allocation21 + $0x1e4] ss:$8 sps:$4 sm:$0xff]  }
 0x5c4   : > { %3354 = vmatprep.subr.bf16.mxu1 %v5207_v59  ;;  %3846 = vmatprep.subr.bf16.mxu0 %v5303_v50  ;;  %v5265_v50 = vld [vmem:[#allocation21 + $0x1e0] ss:$8 sps:$4 sm:$0xff]  }
 0x5c7   : > { %3355 = vmatpush1.bf16.msra.mxu1 %v5205_v10  ;;  %3847 = vmatpush1.bf16.msra.mxu0 %v5301_v51 }
 0x5c8   : > { %3356 = vmatprep.subr.bf16.mxu1 %v5210_v11  ;;  %3848 = vmatprep.subr.bf16.mxu0 %v5306_v32  ;;  %v5223_v11 = vld [vmem:[#allocation21 + $0x100] ss:$8 sps:$4 sm:$0xff]   ;;  %v5270_v32 = vld [vmem:[#allocation21 + $0x1f4] ss:$8 sps:$4 sm:$0xff]  }
 0x5cb   : > { %3357 = vmatpush1.bf16.msra.mxu1 %v5208_v13  ;;  %3849 = vmatpush1.bf16.msra.mxu0 %v5304_v52  ;;  %v5268_v52 = vld [vmem:[#allocation21 + $0x1f0] ss:$8 sps:$4 sm:$0xff]  }
 0x5cc   : > { %3358 = vmatprep.subr.bf16.mxu1 %v5213_v14  ;;  %3850 = vmatprep.subr.bf16.mxu0 %v5309_v33  ;;  %v5228_v14 = vld [vmem:[#allocation21 + $0x114] ss:$8 sps:$4 sm:$0xff]  }
 0x5cf   : > { %3359 = vmatpush1.bf16.msra.mxu1 %v5211_v15  ;;  %3851 = vmatpush1.bf16.msra.mxu0 %v5307_v53 }
 0x5d0   : > { %3360 = vmatprep.subr.bf16.mxu1 %v5216_v16  ;;  %3852 = vmatprep.subr.bf16.mxu0 %v5312_v54  ;;  %v5226_v16 = vld [vmem:[#allocation21 + $0x110] ss:$8 sps:$4 sm:$0xff]  }
 0x5d1   : > { %v5315_v54 = vld [vmem:[#allocation24 + $0x1c4] ss:$16 sps:$4 sm:$0xff]  }
 0x5d3   : > { %3361 = vmatpush1.bf16.msra.mxu1 %v5214_v17  ;;  %3853 = vmatpush1.bf16.msra.mxu0 %v5310_v56  ;;  %v5231_v17 = vld [vmem:[#allocation21 + $0x124] ss:$8 sps:$4 sm:$0xff]  }
 0x5d4   : > { %3362 = vmatprep.subr.bf16.mxu1 %v5219_v18  ;;  %v5229_v18 = vld [vmem:[#allocation21 + $0x120] ss:$8 sps:$4 sm:$0xff]   ;;  %3854 = vmatprep.subr.bf16.mxu0 %v5315_v54 }
 0x5d5   : > { %v5313_v56 = vld [vmem:[#allocation24 + $0x1c0] ss:$16 sps:$4 sm:$0xff]  }
 0x5d7   : > { %3363 = vmatpush1.bf16.msra.mxu1 %v5217_v39  ;;  %v5234_v39 = vld [vmem:[#allocation21 + $0x134] ss:$8 sps:$4 sm:$0xff]   ;;  %3855 = vmatpush1.bf16.msra.mxu0 %v5313_v56  ;;  %v5923_v56 = vmov 1966171168  }
 0x5d8   : > { %3364 = vmatprep.subr.bf16.mxu1 %v5222_v19  ;;  %v5232_v19 = vld [vmem:[#allocation21 + $0x130] ss:$8 sps:$4 sm:$0xff]   ;;  %3856 = vmatprep.subr.bf16.mxu0 %v5318_v55  ;;  %v3915_v55 = vunpack.c.l.s4 %v5923_v56 }
 0x5db   : > { %3365 = vmatpush1.bf16.msra.mxu1 %v5220_v40  ;;  %v5237_v40 = vld [vmem:[#allocation21 + $0x144] ss:$8 sps:$4 sm:$0xff]  }
 0x5dc   : > { %3375 = vmatprep.subr.bf16.mxu1 %v5225_v20  ;;  %v5235_v20 = vld [vmem:[#allocation21 + $0x140] ss:$8 sps:$4 sm:$0xff]  }
 0x671   : > { %v2841_v61 = vpop.f32.mrb[24].mxu1  ;;  %v6607_v62 = vpop.f32.mrb[40].mxu0 }
 0x672   : > { %v4621_v63 = vadd.f32 %v2841_v61, %v2749_v57  ;;  %v2843_v0 = vpop.f32.mrb[25].mxu1  ;;  %v2925_v1 = vpop.f32.mrb[41].mxu0  ;;  %v4623_v51 = vadd.f32 %v6607_v62, %v2757_v48  ;;  %v5316_v57 = vld [vmem:[#allocation24 + $0x1e0] ss:$16 sps:$4 sm:$0xff]  }
 0x673   : > { %v4622_v2 = vadd.f32 %v2843_v0, %v2753_v58  ;;  %v4624_v3 = vadd.f32 %v2925_v1, %v2761_v60  ;;  %v2845_v4 = vpop.f32.mrb[26].mxu1  ;;  %v2927_v5 = vpop.f32.mrb[42].mxu0  ;;  %3857 = vmatpush1.bf16.msra.mxu0 %v5316_v57  ;;  %v5321_v58 = vld [vmem:[#allocation24 + $0xc] ss:$16 sps:$4 sm:$0xff]  }
 0x674   : > { %v2930_v6 = vmax.f32 %v4621_v63, 0.0  ;;  %v2846_v7 = vpop.f32.mrb[27].mxu1  ;;  %v2928_v8 = vpop.f32.mrb[43].mxu0  ;;  %v2932_v33 = vmax.f32 %v4623_v51, 0.0  ;;  %3867 = vmatprep.subr.bf16.mxu0 %v5321_v58  ;;  %v3002_v60 = vld [vmem:[#allocation23] sm:$0x3]  ;;  %v3916_v58 = vunpack.c.0.s8 %v3915_v55 }
 0x675   : > { %v2931_v9 = vmax.f32 %v4622_v2, 0.0  ;;  %v2933_v59 = vmax.f32 %v4624_v3, 0.0  ;;  %v3327_v61 = vrot.slane %v3002_v60, %v6518_v29  ;;  %v3331_v62 = vrot.slane %v3002_v60, %v6521_v31  ;;  %v5319_v8 = vld [vmem:[#allocation24 + $0x8] ss:$16 sps:$4 sm:$0xff]  }
 0x676   : > { %v2934_v13 = vpack.c.bf16 %v2930_v6, %v2930_v6  ;;  %v2936_v53 = vpack.c.bf16 %v2932_v33, %v2932_v33 }
 0x677   : > { %v2935_v10 = vpack.c.bf16 %v2931_v9, %v2931_v9  ;;  %v2937_v15 = vpack.c.bf16 %v2933_v59, %v2933_v59  ;;  %v5324_v59 = vld [vmem:[#allocation24 + $0x2c] ss:$16 sps:$4 sm:$0xff]  }
 0x679   : > { %3366 = vmatprep.mubr.bf16.mxu1 %v2935_v10  ;;  %v5322_v10 = vld [vmem:[#allocation24 + $0x28] ss:$16 sps:$4 sm:$0xff]  }
 0x67a   : > { %3367 = vmatmul.mubr.bf16.vlgmr.msra.gmra.mrb[28].mxu1 %v2934_v13  ;;  %v5325_v13 = vld [vmem:[#allocation24 + $0x48] ss:$16 sps:$4 sm:$0xff]  }
 0x67b   : > { %3376 = vmatpush1.bf16.msra.mxu1 %v5223_v11  ;;  %3407 = vmatprep.mubr.bf16.mxu1 %v2937_v15  ;;  %v5327_v11 = vld [vmem:[#allocation24 + $0x4c] ss:$16 sps:$4 sm:$0xff]   ;;  %v5328_v15 = vld [vmem:[#allocation24 + $0x68] ss:$16 sps:$4 sm:$0xff]  }
 0x67c   : > { %3377 = vmatprep.subr.bf16.mxu1 %v5228_v14  ;;  %v5330_v14 = vld [vmem:[#allocation24 + $0x6c] ss:$16 sps:$4 sm:$0xff]  }
 0x67f   : > { %3378 = vmatpush1.bf16.msra.mxu1 %v5226_v16  ;;  %v5333_v16 = vld [vmem:[#allocation24 + $0x8c] ss:$16 sps:$4 sm:$0xff]  }
 0x680   : > { %3379 = vmatprep.subr.bf16.mxu1 %v5231_v17  ;;  %v5331_v17 = vld [vmem:[#allocation24 + $0x88] ss:$16 sps:$4 sm:$0xff]  }
 0x683   : > { %3380 = vmatpush1.bf16.msra.mxu1 %v5229_v18  ;;  %v5336_v18 = vld [vmem:[#allocation24 + $0xac] ss:$16 sps:$4 sm:$0xff]  }
 0x684   : > { %3381 = vmatprep.subr.bf16.mxu1 %v5234_v39  ;;  %v5334_v39 = vld [vmem:[#allocation24 + $0xa8] ss:$16 sps:$4 sm:$0xff]  }
 0x687   : > { %3382 = vmatpush1.bf16.msra.mxu1 %v5232_v19  ;;  %v5339_v19 = vld [vmem:[#allocation24 + $0xcc] ss:$16 sps:$4 sm:$0xff]  }
 0x688   : > { %3383 = vmatprep.subr.bf16.mxu1 %v5237_v40  ;;  %v5337_v40 = vld [vmem:[#allocation24 + $0xc8] ss:$16 sps:$4 sm:$0xff]  }
 0x68b   : > { %3384 = vmatpush1.bf16.msra.mxu1 %v5235_v20  ;;  %v5342_v20 = vld [vmem:[#allocation24 + $0xec] ss:$16 sps:$4 sm:$0xff]  }
 0x68c   : > { %3385 = vmatprep.subr.bf16.mxu1 %v5240_v21  ;;  %v5340_v21 = vld [vmem:[#allocation24 + $0xe8] ss:$16 sps:$4 sm:$0xff]  }
 0x68f   : > { %3386 = vmatpush1.bf16.msra.mxu1 %v5238_v22  ;;  %v5345_v22 = vld [vmem:[#allocation24 + $0x10c] ss:$16 sps:$4 sm:$0xff]  }
 0x690   : > { %3387 = vmatprep.subr.bf16.mxu1 %v5243_v23  ;;  %v5343_v23 = vld [vmem:[#allocation24 + $0x108] ss:$16 sps:$4 sm:$0xff]  }
 0x693   : > { %3388 = vmatpush1.bf16.msra.mxu1 %v5241_v24  ;;  %v5348_v24 = vld [vmem:[#allocation24 + $0x12c] ss:$16 sps:$4 sm:$0xff]  }
 0x694   : > { %3389 = vmatprep.subr.bf16.mxu1 %v5246_v43  ;;  %v5346_v43 = vld [vmem:[#allocation24 + $0x128] ss:$16 sps:$4 sm:$0xff]  }
 0x697   : > { %3390 = vmatpush1.bf16.msra.mxu1 %v5244_v25  ;;  %v5351_v25 = vld [vmem:[#allocation24 + $0x14c] ss:$16 sps:$4 sm:$0xff]  }
 0x698   : > { %3391 = vmatprep.subr.bf16.mxu1 %v5249_v44  ;;  %v5349_v44 = vld [vmem:[#allocation24 + $0x148] ss:$16 sps:$4 sm:$0xff]  }
 0x69b   : > { %3392 = vmatpush1.bf16.msra.mxu1 %v5247_v26  ;;  %v5354_v26 = vld [vmem:[#allocation24 + $0x16c] ss:$16 sps:$4 sm:$0xff]  }
 0x69c   : > { %3393 = vmatprep.subr.bf16.mxu1 %v5252_v30  ;;  %v5352_v30 = vld [vmem:[#allocation24 + $0x168] ss:$16 sps:$4 sm:$0xff]  }
 0x69f   : > { %3394 = vmatpush1.bf16.msra.mxu1 %v5250_v34  ;;  %v5357_v34 = vld [vmem:[#allocation24 + $0x18c] ss:$16 sps:$4 sm:$0xff]  }
 0x6a0   : > { %3395 = vmatprep.subr.bf16.mxu1 %v5255_v35  ;;  %v5355_v35 = vld [vmem:[#allocation24 + $0x188] ss:$16 sps:$4 sm:$0xff]  }
 0x6a3   : > { %3396 = vmatpush1.bf16.msra.mxu1 %v5253_v37  ;;  %v5360_v37 = vld [vmem:[#allocation24 + $0x1ac] ss:$16 sps:$4 sm:$0xff]  }
 0x6a4   : > { %3397 = vmatprep.subr.bf16.mxu1 %v5258_v41  ;;  %v5358_v41 = vld [vmem:[#allocation24 + $0x1a8] ss:$16 sps:$4 sm:$0xff]  }
 0x6a7   : > { %3398 = vmatpush1.bf16.msra.mxu1 %v5256_v42  ;;  %v5363_v42 = vld [vmem:[#allocation24 + $0x1cc] ss:$16 sps:$4 sm:$0xff]  }
 0x6a8   : > { %3399 = vmatprep.subr.bf16.mxu1 %v5261_v12  ;;  %v5361_v12 = vld [vmem:[#allocation24 + $0x1c8] ss:$16 sps:$4 sm:$0xff]  }
 0x6ab   : > { %3400 = vmatpush1.bf16.msra.mxu1 %v5259_v45  ;;  %v5366_v45 = vld [vmem:[#allocation24 + $0x1ec] ss:$16 sps:$4 sm:$0xff]  }
 0x6ac   : > { %3401 = vmatprep.subr.bf16.mxu1 %v5264_v46  ;;  %v5364_v46 = vld [vmem:[#allocation24 + $0x1e8] ss:$16 sps:$4 sm:$0xff]  }
 0x6af   : > { %3402 = vmatpush1.bf16.msra.mxu1 %v5262_v47  ;;  %v3484_v47 = vld [vmem:[#allocation26] sm:$0xf] }
 0x6b0   : > { %3403 = vmatprep.subr.bf16.mxu1 %v5267_v49  ;;  %v3809_v48 = vrot.slane %v3484_v47, %v6518_v29  ;;  %v3813_v49 = vrot.slane %v3484_v47, %v6521_v31  ;;  %v3817_v57 = vrot.slane %v3484_v47, %v6546_v36  ;;  %v3821_v60 = vrot.slane %v3484_v47, %v6549_v38 }
 0x6b1   : > { %v3919_v31 = vsub.s32 %v3916_v58, %v6515_v28 }
 0x6b3   : > { %3404 = vmatpush1.bf16.msra.mxu1 %v5265_v50 }
 0x6b4   : > { %3405 = vmatprep.subr.bf16.mxu1 %v5270_v32 }
 0x6b7   : > { %3406 = vmatpush1.bf16.msra.mxu1 %v5268_v52 }
 0x6ba   : > { %3408 = vmatmul.mubr.bf16.vlgmr.msra.gmra.mrb[28].mxu1 %v2936_v53 }
 0x78d   : > { %v3409_v63 = vpop.f32.mrb[28].mxu1 }
 0x78e   : > { %v4625_v0 = vadd.f32 %v3409_v63, %v3327_v61  ;;  %v3411_v1 = vpop.f32.mrb[29].mxu1 }
 0x78f   : > { %v4626_v2 = vadd.f32 %v3411_v1, %v3331_v62  ;;  %v3413_v3 = vpop.f32.mrb[30].mxu1 }
 0x790   : > { %v3416_v4 = vmax.f32 %v4625_v0, 0.0  ;;  %v3414_v5 = vpop.f32.mrb[31].mxu1 }
 0x791   : > { %v3417_v6 = vmax.f32 %v4626_v2, 0.0 }
 0x792   : > { %v6614_v9 = vpack.c.bf16 %v3416_v4, %v3416_v4 }
 0x793   : > { %v3419_v7 = vpack.c.bf16 %v3417_v6, %v3417_v6 }
 0x795   : > { %3858 = vmatprep.mubr.bf16.mxu0 %v3419_v7 }
 0x796   : > { %3859 = vmatmul.mubr.bf16.vlgmr.msra.gmra.mrb[44].mxu0 %v6614_v9 }
 0x797   : > { %3868 = vmatpush1.bf16.msra.mxu0 %v5319_v8  ;;  %3899 = vmatprep.mubr.bf16.mxu0 %v3419_v7 }
 0x798   : > { %3869 = vmatprep.subr.bf16.mxu0 %v5324_v59 }
 0x79b   : > { %3870 = vmatpush1.bf16.msra.mxu0 %v5322_v10 }
 0x79c   : > { %3871 = vmatprep.subr.bf16.mxu0 %v5327_v11 }
 0x79f   : > { %3872 = vmatpush1.bf16.msra.mxu0 %v5325_v13 }
 0x7a0   : > { %3873 = vmatprep.subr.bf16.mxu0 %v5330_v14 }
 0x7a3   : > { %3874 = vmatpush1.bf16.msra.mxu0 %v5328_v15 }
 0x7a4   : > { %3875 = vmatprep.subr.bf16.mxu0 %v5333_v16 }
 0x7a7   : > { %3876 = vmatpush1.bf16.msra.mxu0 %v5331_v17 }
 0x7a8   : > { %3877 = vmatprep.subr.bf16.mxu0 %v5336_v18 }
 0x7ab   : > { %3878 = vmatpush1.bf16.msra.mxu0 %v5334_v39 }
 0x7ac   : > { %3879 = vmatprep.subr.bf16.mxu0 %v5339_v19 }
 0x7af   : > { %3880 = vmatpush1.bf16.msra.mxu0 %v5337_v40 }
 0x7b0   : > { %3881 = vmatprep.subr.bf16.mxu0 %v5342_v20 }
 0x7b3   : > { %3882 = vmatpush1.bf16.msra.mxu0 %v5340_v21 }
 0x7b4   : > { %3883 = vmatprep.subr.bf16.mxu0 %v5345_v22 }
 0x7b7   : > { %3884 = vmatpush1.bf16.msra.mxu0 %v5343_v23 }
 0x7b8   : > { %3885 = vmatprep.subr.bf16.mxu0 %v5348_v24 }
 0x7bb   : > { %3886 = vmatpush1.bf16.msra.mxu0 %v5346_v43 }
 0x7bc   : > { %3887 = vmatprep.subr.bf16.mxu0 %v5351_v25 }
 0x7bf   : > { %3888 = vmatpush1.bf16.msra.mxu0 %v5349_v44 }
 0x7c0   : > { %3889 = vmatprep.subr.bf16.mxu0 %v5354_v26 }
 0x7c3   : > { %3890 = vmatpush1.bf16.msra.mxu0 %v5352_v30 }
 0x7c4   : > { %3891 = vmatprep.subr.bf16.mxu0 %v5357_v34 }
 0x7c7   : > { %3892 = vmatpush1.bf16.msra.mxu0 %v5355_v35 }
 0x7c8   : > { %3893 = vmatprep.subr.bf16.mxu0 %v5360_v37 }
 0x7cb   : > { %3894 = vmatpush1.bf16.msra.mxu0 %v5358_v41 }
 0x7cc   : > { %3895 = vmatprep.subr.bf16.mxu0 %v5363_v42 }
 0x7cf   : > { %3896 = vmatpush1.bf16.msra.mxu0 %v5361_v12 }
 0x7d0   : > { %3897 = vmatprep.subr.bf16.mxu0 %v5366_v45 }
 0x7d3   : > { %3898 = vmatpush1.bf16.msra.mxu0 %v5364_v46 }
 0x7d6   : > { %3900 = vmatmul.mubr.bf16.vlgmr.msra.gmra.mrb[48].mxu0 %v6614_v9 }
 0x869   : > { %v3860_v50 = vpop.f32.mrb[44].mxu0 }
 0x86a   : > { %v3861_v51 = vadd.f32 %v3860_v50, %v3809_v48  ;;  %v3862_v32 = vpop.f32.mrb[45].mxu0 }
 0x86b   : > { %v3863_v52 = vadd.f32 %v3862_v32, %v3813_v49  ;;  %v3864_v33 = vpop.f32.mrb[46].mxu0 }
 0x86c   : > { %v3865_v53 = vpop.f32.mrb[47].mxu0 }
 0x86d   : > { %v3912_v54 = vcombine.low %v3861_v51, %v3863_v52 }
 0x86f   : > { %v3920_v3 = vrot.slane %v3912_v54, %v3919_v31 }
 0x8a9   : > { %v3901_v61 = vpop.f32.mrb[48].mxu0 }
 0x8aa   : > { %v3902_v29 = vadd.f32 %v3901_v61, %v3817_v57  ;;  %v3903_v62 = vpop.f32.mrb[49].mxu0 }
 0x8ab   : > { %v3904_v63 = vadd.f32 %v3903_v62, %v3821_v60  ;;  %v3905_v0 = vpop.f32.mrb[50].mxu0 }
 0x8ac   : > { %v3906_v1 = vpop.f32.mrb[51].mxu0 }
 0x8ad   : > { %v3913_v2 = vcombine.low %v3902_v29, %v3904_v63 }
 0x8af   : > { %v3927_v4 = vrot.slane %v3913_v2, %v3919_v31 }
 0x8b1   : > { %v3928_v36 = vcombine.low %v3920_v3, %v3927_v4 }
 0x8b3   : > { %v3935_v38 = vrot.slane %v3928_v36, %v3919_v31 }
 0x8b5   : > { %3941 = vst.msk [vmem:[%s715_s16] sm:$0xf] %vm3939_vm2, %v3935_v38 }
 0x8b6   : > { %5802 = shalt.err (!%p5799_p8)
}
 0x8b7   : > { %s5803_s4 = scalar_lea.hbm %s6629_s24, 64  ;;  %s5807_s17 = scalar_lea.hbm %s6753_s15, 128 }
 0x8b8   : > { %p5804_p9 = scmp.ne.s32.totalorder %s6629_s24, %s5803_s4  ;;  %p5808_p3 = scmp.lt.u32.totalorder %s6629_s24, %s6753_s15 }
 0x8b9   : > { %p5809_p7 = scmp.lt.u32.totalorder %s5807_s17, %s5803_s4  ;;  %p5811_p11 = scmp.lt.u32.totalorder %s5803_s4, %s6629_s24 }
 0x8ba   : > { %p5805_p4 = pnand %p5804_p9, %p6754_p0 }
 0x8bb   : > { %p5810_p12 = por %p5809_p7, %p5808_p3 }
 0x8bc   : > { %p5806_p6 = pneg %p5805_p4 }
 0x8bd   : > { %p5812_p5 = por %p5811_p11, %p5810_p12 }
 0x8bf   : > { %p5813_p1 = pnand %p5812_p5, %p5806_p6 }
 0x8c1   : > { %5816 = shalt.err (!%p5813_p1)
}
 0x8c2   : > { %4698 = dma.vmem_to_hbm [thread:$0]  (%p6754_p0), %s6631_s1, 64, %s6629_s24, %s3943_s19  }
 0x8c3 PF: > { %s6755_s29 = sld [smem:[#allocation37_spill]]  ;;  %p6756_p10 = scmp.ne.s32.totalorder %s6742_s21, 0 }
 0x8c4   : > { %p6757_p13 = scmp.ge.s32.totalorder %s5899_s23, 2 }
 0x8c6   : > { %p4748_p2 = pnand %p6757_p13, %p6756_p10 }
 0x8c9   : > { %s3969_s2 = sand.u32 1, %s6755_s29  }
 0x8ca   : > { %s3970_s3 = scalar_lea.sflag [#allocation5], %s3969_s2 }
 0x8cb   : > { %5874 = dma.done.wait (!%p4748_p2), %s3970_s3, 64  }
 0x8cc   : > { %5876 = vsyncadd (!%p4748_p2), %s3970_s3, 4294967232  ;;  %s38_s23 = sadd.s32 1, %s5899_s23   ;;  %s6758_s18 = sld [smem:[#allocation38_spill]] }
 0x8cd   : > { %p35_p8 = scmp.ge.s32.totalorder %s38_s23, 4   ;;  %s6759_s19 = smov %s5887_s20 }
 0x8ce   : > { %s6760_s20 = smov %s6408_s26  ;;  %s6761_s21 = smov %s5895_s22 }
 0x8cf   : > { %s6762_s22 = smov %s6764_s25  ;;  %37 = sbr.rel (!%p35_p8) target bundleno = 20 (0x14), region = 189 }
 0x8d6   :  { %3975 = vsyncpa [#allocation4], 1 }
 0x8d7   :  { %3977 = vsyncpa [#allocation4 + $0x1], 1 }
 0x8d8   :  { %3978 = vsyncpa [#allocation7], 1 }
 0x8d9   :  { %3979 = vsyncpa [#allocation10], 1 }
 0x8da   :  { %3980 = vsyncpa [#allocation13], 1 }
 0x8db   :  { %3981 = vsyncpa [#allocation16], 1 }
 0x8dc   :  { %3982 = vsyncpa [#allocation19], 1 }
 0x8dd   :  { %3983 = vsyncpa [#allocation22], 1 }
 0x8de   :  { %3984 = vsyncpa [#allocation25], 1 }
 0x8df   :  { %3985 = vsyncpa [#allocation5], 1 }
 0x8e0   :  { %3987 = vsyncpa [#allocation5 + $0x1], 1 }

</bundles_post_ra>
